<compile_context>
chip_gen: v6e
topology: v6e:2x2x1
jax: 0.10.0
libtpu: 0.0.40
codegen_flags: <defaults>
</compile_context>

<pallas_src>
import jax
import jax.numpy as jnp
from jax import lax
from jax.experimental import pallas as pl
from jax.experimental.pallas import tpu as pltpu

# ----------------------------- small synthetic config -----------------------------
IMG = 16          # image height/width
PATCH = 8         # patch size  -> 2x2 = 4 patches
CIN = 3           # input channels (BEiT takes RGB)
D = 32            # hidden size (stands in for 768)
H = 4             # attention heads
HD = D // H       # head dim
DI = 4 * D        # MLP intermediate size (128 -> lane aligned)
LAYERS = 2        # encoder layers
FC = 16           # fc_layer_size of the custom classifier
NCLS = 4          # n_classes
LN_EPS = 1e-12    # BEiT layer_norm_eps
LAYER_SCALE = 0.1 # layer_scale_init_value

P = (IMG // PATCH) ** 2        # num patches = 4
S = P + 1                      # tokens (CLS + patches) = 5
S_PAD = 8                      # padded sequence length (sublane friendly)
K_PATCH = CIN * PATCH * PATCH  # 192 = im2col width
K_EMB = K_PATCH + 2            # +1 CLS indicator col, +1 bias indicator col
K_PAD = 256                    # lane-aligned padded im2col width
FC_PAD = 128                   # lane-aligned classifier hidden width
NOUT = 128                     # lane-dense padded classifier output (sliced to NCLS outside)


# ----------------------------- in-kernel helpers -----------------------------

def _layernorm(v, w, b):
    mu = jnp.mean(v, axis=-1, keepdims=True)
    var = jnp.mean((v - mu) ** 2, axis=-1, keepdims=True)
    return (v - mu) * lax.rsqrt(var + LN_EPS) * w + b


# ----------------------------- the gridded kernel -----------------------------
# grid = (batch, layer); residual stream x lives in a VMEM scratch across the layer axis.

def _beit_fwd_kernel(a_ref, wemb_ref, wqkv_ref, qkvb_ref, wo_ref,
                     wi_ref, bi_ref, wo2_ref, vecs_ref, rel_ref,
                     hvec_ref, fc1w_ref, fc1b_ref, fc2w_ref, fc2b_ref,
                     out_ref, x_ref):
    bf16 = jnp.bfloat16
    l = pl.program_id(1)

    # ---- fused patch embedding (first layer step of each batch element only):
    #      one matmul emits [CLS | patch@W + b | zero-pad] token rows ----
    @pl.when(l == 0)
    def _():
        x_ref[...] = jnp.dot(a_ref[0], wemb_ref[...],
                             preferred_element_type=jnp.float32)          # (S_PAD, D) f32

    x = x_ref[...]                                                        # (S_PAD, D) f32
    vl = vecs_ref[0]          # (8, D): ln1_w, ln1_b, lam1, ln2_w, ln2_b, lam2, bo, bo2

    # ---------------- self-attention block (pre-LN) ----------------
    h1 = _layernorm(x, vl[0:1], vl[1:2]).astype(bf16)                     # single cast
    # one full-width QKV matmul (scale 1/sqrt(HD) folded into the q columns / bias)
    qkv = (jnp.dot(h1, wqkv_ref[0], preferred_element_type=jnp.float32)
           + qkvb_ref[0]).astype(bf16)                                    # (S_PAD, 3D)
    # split into head-major (H, S_PAD, HD) only for the tiny score/context bmms
    q = jnp.stack([qkv[:, 0 * D + h * HD: 0 * D + (h + 1) * HD] for h in range(H)], 0)
    k = jnp.stack([qkv[:, 1 * D + h * HD: 1 * D + (h + 1) * HD] for h in range(H)], 0)
    v = jnp.stack([qkv[:, 2 * D + h * HD: 2 * D + (h + 1) * HD] for h in range(H)], 0)

    s = jnp.einsum('hqd,hkd->hqk', q, k, preferred_element_type=jnp.float32)  # (H, S, S)
    # relative-position bias + in-kernel padded-key mask (no dense host-side mask tensor)
    kmask = jnp.where(lax.broadcasted_iota(jnp.int32, (1, 1, S_PAD), 2) < S, 0.0, -1e9)
    s = s + rel_ref[0] + kmask
    s = s - jnp.max(s, axis=-1, keepdims=True)
    p = jnp.exp(s)
    p = p * pl.reciprocal(jnp.sum(p, axis=-1, keepdims=True), approx=True)

    ctx = jnp.einsum('hqk,hkd->hqd', p.astype(bf16), v,
                     preferred_element_type=jnp.float32)                  # (H, S_PAD, HD)
    # merge heads along lanes and do ONE full-depth output projection
    ctx2d = jnp.concatenate([ctx[h] for h in range(H)], axis=-1).astype(bf16)  # (S_PAD, D)
    attn = jnp.dot(ctx2d, wo_ref[0], preferred_element_type=jnp.float32) + vl[6:7]
    x = x + vl[2:3] * attn            # layer-scale lambda_1; drop_path = identity (eval)

    # ---------------- MLP block (pre-LN), exact GELU ----------------
    h2 = _layernorm(x, vl[3:4], vl[4:5]).astype(bf16)
    m = jnp.dot(h2, wi_ref[0], preferred_element_type=jnp.float32) + bi_ref[0]  # (S_PAD, DI)
    m = 0.5 * m * (1.0 + lax.erf(m * 0.7071067811865476))    # exact GELU (BEiT), f32
    m = jnp.dot(m.astype(bf16), wo2_ref[0], preferred_element_type=jnp.float32) + vl[7:8]
    x = x + vl[5:6] * m               # layer-scale lambda_2
    x_ref[...] = x

    # ---- head (last layer step only): masked mean-pool patch tokens -> pooler LN
    #      -> Linear -> (Dropout = identity) -> Linear ----
    @pl.when(l == pl.num_programs(1) - 1)
    def _():
        rid = lax.broadcasted_iota(jnp.int32, (S_PAD, 1), 0)
        rw = jnp.where((rid >= 1) & (rid < S), 1.0 / P, 0.0)              # patch-token mask
        pooled = jnp.sum(x * rw, axis=0, keepdims=True)                   # (1, D)
        hv = hvec_ref[...]
        pooled = _layernorm(pooled, hv[0:1], hv[1:2])
        hcls = (jnp.dot(pooled.astype(bf16), fc1w_ref[...],
                        preferred_element_type=jnp.float32) + fc1b_ref[...])
        logits = (jnp.dot(hcls.astype(bf16), fc2w_ref[...],
                          preferred_element_type=jnp.float32) + fc2b_ref[...])   # (1, NOUT)
        out_ref[0] = jnp.broadcast_to(logits, (S_PAD, NOUT))


# ----------------------------- wrapper / glue -----------------------------

def extract_patches(pixels):
    # NCHW -> (B, num_patches, CIN*PATCH*PATCH), flattened in (C, ph, pw) order
    # to match PyTorch Conv2d weight.reshape(D, -1) layout.
    b = pixels.shape[0]
    g = IMG // PATCH
    x = pixels.reshape(b, CIN, g, PATCH, g, PATCH)
    x = x.transpose(0, 2, 4, 1, 3, 5)              # (B, gh, gw, C, ph, pw)
    return x.reshape(b, g * g, K_PATCH)


@jax.jit
def beit_forward(pixels, params):
    b = pixels.shape[0]

    # im2col + indicator columns so the kernel's first matmul builds the token matrix
    # rows [CLS | patches@W + bias | zero padding] directly; pre-padded to 256 lanes.
    patches = extract_patches(pixels)                               # (B, P, K_PATCH)
    a = jnp.zeros((b, S_PAD, K_PAD), jnp.float32)
    a = a.at[:, 1:S, :K_PATCH].set(patches)
    a = a.at[:, 0, K_PATCH].set(1.0)          # selects cls_token row of w_emb
    a = a.at[:, 1:S, K_PATCH + 1].set(1.0)    # selects patch-bias row of w_emb
    a = a.astype(jnp.bfloat16)

    out = pl.pallas_call(
        _beit_fwd_kernel,
        out_shape=jax.ShapeDtypeStruct((b, S_PAD, NOUT), jnp.float32),
        grid_spec=pltpu.PrefetchScalarGridSpec(
            num_scalar_prefetch=0,
            grid=(b, LAYERS),
            in_specs=[
                pl.BlockSpec((1, S_PAD, K_PAD), lambda bb, ll: (bb, 0, 0)),   # a (per batch)
                pl.BlockSpec((K_PAD, D), lambda bb, ll: (0, 0)),              # w_emb
                pl.BlockSpec((1, D, 3 * D), lambda bb, ll: (ll, 0, 0)),       # wqkv (per layer)
                pl.BlockSpec((1, 1, 3 * D), lambda bb, ll: (ll, 0, 0)),       # qkv bias
                pl.BlockSpec((1, D, D), lambda bb, ll: (ll, 0, 0)),           # wo
                pl.BlockSpec((1, D, DI), lambda bb, ll: (ll, 0, 0)),          # wi
                pl.BlockSpec((1, 1, DI), lambda bb, ll: (ll, 0, 0)),          # bi
                pl.BlockSpec((1, DI, D), lambda bb, ll: (ll, 0, 0)),          # wo2
                pl.BlockSpec((1, 8, D), lambda bb, ll: (ll, 0, 0)),           # packed vecs
                pl.BlockSpec((1, H, S_PAD, S_PAD), lambda bb, ll: (ll, 0, 0, 0)),  # rel bias
                pl.BlockSpec((2, D), lambda bb, ll: (0, 0)),                  # pooler LN
                pl.BlockSpec((D, FC_PAD), lambda bb, ll: (0, 0)),             # fc1 w
                pl.BlockSpec((1, FC_PAD), lambda bb, ll: (0, 0)),             # fc1 b
                pl.BlockSpec((FC_PAD, NOUT), lambda bb, ll: (0, 0)),          # fc2 w
                pl.BlockSpec((1, NOUT), lambda bb, ll: (0, 0)),               # fc2 b
            ],
            out_specs=pl.BlockSpec((1, S_PAD, NOUT), lambda bb, ll: (bb, 0, 0)),
            scratch_shapes=[pltpu.VMEM((S_PAD, D), jnp.float32)],             # residual stream
        ),
        compiler_params=pltpu.CompilerParams(
            dimension_semantics=("parallel", "arbitrary")),
    )(a, params["w_emb"], params["wqkv"], params["qkv_b"], params["wo"],
      params["wi"], params["bi"], params["wo2"], params["vecs"], params["rel_bias"],
      params["head_vecs"], params["fc1_w"], params["fc1_b"], params["fc2_w"],
      params["fc2_b"])
    return out[:, 0, :NCLS]


# ----------------------------- deterministic parameter init -----------------------------

class KeyGen:
    def __init__(self, seed):
        self.key = jax.random.PRNGKey(seed)

    def __call__(self):
        self.key, sub = jax.random.split(self.key)
        return sub


def make_params():
    kg = KeyGen(0)
    bf16 = jnp.bfloat16

    def nrm(shape, scale=0.02):
        return jax.random.normal(kg(), shape, jnp.float32) * scale

    scale = 1.0 / (HD ** 0.5)

    wqkv_l, qkvb_l, wo_l, wi_l, bi_l, wo2_l, vecs_l, rel_l = ([] for _ in range(8))
    for _ in range(LAYERS):
        wq = nrm((D, D)); bq = nrm((D,))
        wk = nrm((D, D))                        # BEiT: no key bias
        wv = nrm((D, D)); bv = nrm((D,))
        wo = nrm((D, D)); bo = nrm((D,))
        wi = nrm((D, DI)); bi = nrm((DI,))
        wo2 = nrm((DI, D)); bo2 = nrm((D,))
        # fused QKV weight (D, 3D); 1/sqrt(HD) folded into the q columns and q bias
        wqkv_l.append(jnp.concatenate([wq * scale, wk, wv], axis=1).astype(bf16))
        qkvb_l.append(jnp.concatenate([bq * scale, jnp.zeros((D,), jnp.float32), bv]
                                      ).reshape(1, 3 * D))
        wo_l.append(wo.astype(bf16))
        wi_l.append(wi.astype(bf16))
        bi_l.append(bi.reshape(1, DI))
        wo2_l.append(wo2.astype(bf16))
        # packed per-layer vectors: ln1_w, ln1_b, lam1, ln2_w, ln2_b, lam2, bo, bo2
        vecs_l.append(jnp.stack([
            jnp.ones((D,), jnp.float32), jnp.zeros((D,), jnp.float32),
            jnp.full((D,), LAYER_SCALE, jnp.float32),
            jnp.ones((D,), jnp.float32), jnp.zeros((D,), jnp.float32),
            jnp.full((D,), LAYER_SCALE, jnp.float32),
            bo, bo2], axis=0))
        # TODO(synk): the relative-position-bias table -> index gather is materialized on the
        # host as a dense per-layer (H, S_PAD, S_PAD) bias (glue), not an in-kernel gather.
        rel_l.append(nrm((H, S_PAD, S_PAD)))

    # fused patch-embed weight, padded to 256 rows: [patch conv weight ; cls_token ; patch bias]
    w_emb = jnp.zeros((K_PAD, D), jnp.float32)
    w_emb = w_emb.at[:K_PATCH].set(nrm((K_PATCH, D)))
    w_emb = w_emb.at[K_PATCH].set(nrm((D,)))            # cls_token
    w_emb = w_emb.at[K_PATCH + 1].set(nrm((D,)))        # patch-embed bias
    w_emb = w_emb.astype(bf16)

    # classifier: Linear(D, FC) -> Dropout (identity in eval) -> Linear(FC, NCLS),
    # with inner width padded to 128 lanes and the output padded lane-dense to NOUT.
    fc1_w = jnp.zeros((D, FC_PAD), jnp.float32).at[:, :FC].set(nrm((D, FC))).astype(bf16)
    fc1_b = jnp.zeros((1, FC_PAD), jnp.float32).at[0, :FC].set(nrm((FC,)))
    fc2_w = jnp.zeros((FC_PAD, NOUT), jnp.float32).at[:FC, :NCLS].set(nrm((FC, NCLS))).astype(bf16)
    fc2_b = jnp.zeros((1, NOUT), jnp.float32).at[0, :NCLS].set(nrm((NCLS,)))

    return dict(
        w_emb=w_emb,
        wqkv=jnp.stack(wqkv_l), qkv_b=jnp.stack(qkvb_l), wo=jnp.stack(wo_l),
        wi=jnp.stack(wi_l), bi=jnp.stack(bi_l), wo2=jnp.stack(wo2_l),
        vecs=jnp.stack(vecs_l),
        rel_bias=jnp.stack(rel_l),                                    # (LAYERS, H, S_PAD, S_PAD)
        head_vecs=jnp.stack([jnp.ones((D,), jnp.float32),             # pooler LN gamma
                             jnp.zeros((D,), jnp.float32)], axis=0),  # pooler LN beta
        fc1_w=fc1_w, fc1_b=fc1_b, fc2_w=fc2_w, fc2_b=fc2_b,
    )


if __name__ == "__main__":
    params = make_params()
    x = jax.random.normal(jax.random.PRNGKey(0), (2, CIN, IMG, IMG), jnp.float32)  # NCHW
    logits = beit_forward(x, params)
    logits = jax.block_until_ready(logits)
    assert logits.shape == (2, NCLS)
    assert bool(jnp.all(jnp.isfinite(logits)))
    print("KERNEL_OK")
</pallas_src>

<mosaic_0001>
module attributes {stable_mosaic.version = 11 : i64} {
  func.func @_beit_fwd_kernel(%arg0: i32, %arg1: i32, %arg2: memref<1x8x256xbf16, #tpu.memory_space<vmem>>, %arg3: memref<256x32xbf16, #tpu.memory_space<vmem>>, %arg4: memref<1x32x96xbf16, #tpu.memory_space<vmem>>, %arg5: memref<1x1x96xf32, #tpu.memory_space<vmem>>, %arg6: memref<1x32x32xbf16, #tpu.memory_space<vmem>>, %arg7: memref<1x32x128xbf16, #tpu.memory_space<vmem>>, %arg8: memref<1x1x128xf32, #tpu.memory_space<vmem>>, %arg9: memref<1x128x32xbf16, #tpu.memory_space<vmem>>, %arg10: memref<1x8x32xf32, #tpu.memory_space<vmem>>, %arg11: memref<1x4x8x8xf32, #tpu.memory_space<vmem>>, %arg12: memref<2x32xf32, #tpu.memory_space<vmem>>, %arg13: memref<32x128xbf16, #tpu.memory_space<vmem>>, %arg14: memref<1x128xf32, #tpu.memory_space<vmem>>, %arg15: memref<128x128xbf16, #tpu.memory_space<vmem>>, %arg16: memref<1x128xf32, #tpu.memory_space<vmem>>, %arg17: memref<1x8x128xf32, #tpu.memory_space<vmem>>, %arg18: memref<8x32xf32, #tpu.memory_space<vmem>>) attributes {dimension_semantics = [#tpu.dimension_semantics<parallel>, #tpu.dimension_semantics<arbitrary>], iteration_bounds = array<i64: 2, 2>, scalar_prefetch = 0 : i64, scratch_operands = 1 : i64, tpu.core_type = #tpu.core_type<tc>, window_params = [{transform_indices = @transform_0, window_bounds = array<i64: 1, 8, 256>}, {pipeline_mode = #tpu.pipeline_mode<synchronous>, transform_indices = @transform_1, window_bounds = array<i64: 256, 32>}, {transform_indices = @transform_2, window_bounds = array<i64: 1, 32, 96>}, {transform_indices = @transform_3, window_bounds = array<i64: 1, 1, 96>}, {transform_indices = @transform_4, window_bounds = array<i64: 1, 32, 32>}, {transform_indices = @transform_5, window_bounds = array<i64: 1, 32, 128>}, {transform_indices = @transform_6, window_bounds = array<i64: 1, 1, 128>}, {transform_indices = @transform_7, window_bounds = array<i64: 1, 128, 32>}, {transform_indices = @transform_8, window_bounds = array<i64: 1, 8, 32>}, {transform_indices = @transform_9, window_bounds = array<i64: 1, 4, 8, 8>}, {pipeline_mode = #tpu.pipeline_mode<synchronous>, transform_indices = @transform_10, window_bounds = array<i64: 2, 32>}, {pipeline_mode = #tpu.pipeline_mode<synchronous>, transform_indices = @transform_11, window_bounds = array<i64: 32, 128>}, {pipeline_mode = #tpu.pipeline_mode<synchronous>, transform_indices = @transform_12, window_bounds = array<i64: 1, 128>}, {pipeline_mode = #tpu.pipeline_mode<synchronous>, transform_indices = @transform_13, window_bounds = array<i64: 128, 128>}, {pipeline_mode = #tpu.pipeline_mode<synchronous>, transform_indices = @transform_14, window_bounds = array<i64: 1, 128>}, {transform_indices = @transform_15, window_bounds = array<i64: 1, 8, 128>}]} {
    %c0_i32 = arith.constant 0 : i32
    %0 = arith.cmpi eq, %arg1, %c0_i32 : i32
    %1 = arith.extui %0 : i1 to i32
    %c0_i32_0 = arith.constant 0 : i32
    %2 = arith.cmpi ne, %1, %c0_i32_0 : i32
    scf.if %2 {
      %c0_52 = arith.constant 0 : index
      %c0_53 = arith.constant 0 : index
      %c0_54 = arith.constant 0 : index
      %165 = vector.load %arg2[%c0_52, %c0_53, %c0_54] : memref<1x8x256xbf16, #tpu.memory_space<vmem>>, vector<1x8x256xbf16>
      %166 = vector.shape_cast %165 : vector<1x8x256xbf16> to vector<8x256xbf16>
      %c0_55 = arith.constant 0 : index
      %c0_56 = arith.constant 0 : index
      %167 = vector.load %arg3[%c0_55, %c0_56] : memref<256x32xbf16, #tpu.memory_space<vmem>>, vector<256x32xbf16>
      %cst_57 = arith.constant dense<0.000000e+00> : vector<8x32xf32>
      %168 = tpu.matmul %166, %167, %cst_57 {dimension_numbers = #tpu.dot_dimension_numbers<[1], [0], [0], [1], [0, 0, 1, 1], [], []>} : vector<8x256xbf16>, vector<256x32xbf16>, vector<8x32xf32> -> vector<8x32xf32>
      %c0_58 = arith.constant 0 : index
      %c0_59 = arith.constant 0 : index
      %169 = vector.load %arg18[%c0_58, %c0_59] : memref<8x32xf32, #tpu.memory_space<vmem>>, vector<8x32xf32>
      tpu.vector_store %arg18[%c0_58, %c0_59], %168 {strides = array<i32>} : memref<8x32xf32, #tpu.memory_space<vmem>>, vector<8x32xf32>,
    } else {
    }
    %c0 = arith.constant 0 : index
    %c0_1 = arith.constant 0 : index
    %3 = vector.load %arg18[%c0, %c0_1] : memref<8x32xf32, #tpu.memory_space<vmem>>, vector<8x32xf32>
    %c0_2 = arith.constant 0 : index
    %c0_3 = arith.constant 0 : index
    %c0_4 = arith.constant 0 : index
    %4 = vector.load %arg10[%c0_2, %c0_3, %c0_4] : memref<1x8x32xf32, #tpu.memory_space<vmem>>, vector<1x8x32xf32>
    %5 = vector.shape_cast %4 : vector<1x8x32xf32> to vector<8x32xf32>
    %6 = vector.extract_strided_slice %5 {offsets = [0, 0], sizes = [1, 32], strides = [1, 1]} : vector<8x32xf32> to vector<1x32xf32>
    %7 = vector.extract_strided_slice %5 {offsets = [1, 0], sizes = [1, 32], strides = [1, 1]} : vector<8x32xf32> to vector<1x32xf32>
    %cst = arith.constant dense<0.000000e+00> : vector<8xf32>
    %8 = vector.multi_reduction <add>, %3, %cst [1] : vector<8x32xf32> to vector<8xf32>
    %9 = vector.shape_cast %8 : vector<8xf32> to vector<8x1xf32>
    %cst_5 = arith.constant 3.200000e+01 : f32
    %10 = vector.broadcast %cst_5 : f32 to vector<8x1xf32>
    %11 = arith.divf %9, %10 : vector<8x1xf32>
    %12 = vector.broadcast %11 : vector<8x1xf32> to vector<8x32xf32>
    %13 = arith.subf %3, %12 : vector<8x32xf32>
    %14 = arith.mulf %13, %13 : vector<8x32xf32>
    %cst_6 = arith.constant dense<0.000000e+00> : vector<8xf32>
    %15 = vector.multi_reduction <add>, %14, %cst_6 [1] : vector<8x32xf32> to vector<8xf32>
    %16 = vector.shape_cast %15 : vector<8xf32> to vector<8x1xf32>
    %cst_7 = arith.constant 3.200000e+01 : f32
    %17 = vector.broadcast %cst_7 : f32 to vector<8x1xf32>
    %18 = arith.divf %16, %17 : vector<8x1xf32>
    %19 = vector.broadcast %11 : vector<8x1xf32> to vector<8x32xf32>
    %20 = arith.subf %3, %19 : vector<8x32xf32>
    %cst_8 = arith.constant 9.99999996E-13 : f32
    %21 = vector.broadcast %cst_8 : f32 to vector<8x1xf32>
    %22 = arith.addf %18, %21 : vector<8x1xf32>
    %23 = math.rsqrt %22 : vector<8x1xf32>
    %24 = vector.broadcast %23 : vector<8x1xf32> to vector<8x32xf32>
    %25 = arith.mulf %20, %24 : vector<8x32xf32>
    %26 = vector.broadcast %6 : vector<1x32xf32> to vector<8x32xf32>
    %27 = arith.mulf %25, %26 : vector<8x32xf32>
    %28 = vector.broadcast %7 : vector<1x32xf32> to vector<8x32xf32>
    %29 = arith.addf %27, %28 : vector<8x32xf32>
    %30 = arith.truncf %29 : vector<8x32xf32> to vector<8x32xbf16>
    %c0_9 = arith.constant 0 : index
    %c0_10 = arith.constant 0 : index
    %c0_11 = arith.constant 0 : index
    %31 = vector.load %arg4[%c0_9, %c0_10, %c0_11] : memref<1x32x96xbf16, #tpu.memory_space<vmem>>, vector<1x32x96xbf16>
    %32 = vector.shape_cast %31 : vector<1x32x96xbf16> to vector<32x96xbf16>
    %cst_12 = arith.constant dense<0.000000e+00> : vector<8x96xf32>
    %33 = tpu.matmul %30, %32, %cst_12 {dimension_numbers = #tpu.dot_dimension_numbers<[1], [0], [0], [1], [0, 0, 1, 1], [], []>} : vector<8x32xbf16>, vector<32x96xbf16>, vector<8x96xf32> -> vector<8x96xf32>
    %c0_13 = arith.constant 0 : index
    %c0_14 = arith.constant 0 : index
    %c0_15 = arith.constant 0 : index
    %34 = vector.load %arg5[%c0_13, %c0_14, %c0_15] : memref<1x1x96xf32, #tpu.memory_space<vmem>>, vector<1x1x96xf32>
    %35 = vector.shape_cast %34 : vector<1x1x96xf32> to vector<1x96xf32>
    %36 = vector.broadcast %35 : vector<1x96xf32> to vector<8x96xf32>
    %37 = arith.addf %33, %36 : vector<8x96xf32>
    %38 = arith.truncf %37 : vector<8x96xf32> to vector<8x96xbf16>
    %39 = vector.extract_strided_slice %38 {offsets = [0, 0], sizes = [8, 8], strides = [1, 1]} : vector<8x96xbf16> to vector<8x8xbf16>
    %40 = vector.extract_strided_slice %38 {offsets = [0, 8], sizes = [8, 8], strides = [1, 1]} : vector<8x96xbf16> to vector<8x8xbf16>
    %41 = vector.extract_strided_slice %38 {offsets = [0, 16], sizes = [8, 8], strides = [1, 1]} : vector<8x96xbf16> to vector<8x8xbf16>
    %42 = vector.extract_strided_slice %38 {offsets = [0, 24], sizes = [8, 8], strides = [1, 1]} : vector<8x96xbf16> to vector<8x8xbf16>
    %43 = vector.shape_cast %39 : vector<8x8xbf16> to vector<1x8x8xbf16>
    %44 = vector.shape_cast %40 : vector<8x8xbf16> to vector<1x8x8xbf16>
    %45 = vector.shape_cast %41 : vector<8x8xbf16> to vector<1x8x8xbf16>
    %46 = vector.shape_cast %42 : vector<8x8xbf16> to vector<1x8x8xbf16>
    %47 = tpu.concatenate %43, %44, %45, %46 in 0 : vector<1x8x8xbf16>, vector<1x8x8xbf16>, vector<1x8x8xbf16>, vector<1x8x8xbf16> -> vector<4x8x8xbf16>
    %48 = vector.extract_strided_slice %38 {offsets = [0, 32], sizes = [8, 8], strides = [1, 1]} : vector<8x96xbf16> to vector<8x8xbf16>
    %49 = vector.extract_strided_slice %38 {offsets = [0, 40], sizes = [8, 8], strides = [1, 1]} : vector<8x96xbf16> to vector<8x8xbf16>
    %50 = vector.extract_strided_slice %38 {offsets = [0, 48], sizes = [8, 8], strides = [1, 1]} : vector<8x96xbf16> to vector<8x8xbf16>
    %51 = vector.extract_strided_slice %38 {offsets = [0, 56], sizes = [8, 8], strides = [1, 1]} : vector<8x96xbf16> to vector<8x8xbf16>
    %52 = vector.shape_cast %48 : vector<8x8xbf16> to vector<1x8x8xbf16>
    %53 = vector.shape_cast %49 : vector<8x8xbf16> to vector<1x8x8xbf16>
    %54 = vector.shape_cast %50 : vector<8x8xbf16> to vector<1x8x8xbf16>
    %55 = vector.shape_cast %51 : vector<8x8xbf16> to vector<1x8x8xbf16>
    %56 = tpu.concatenate %52, %53, %54, %55 in 0 : vector<1x8x8xbf16>, vector<1x8x8xbf16>, vector<1x8x8xbf16>, vector<1x8x8xbf16> -> vector<4x8x8xbf16>
    %57 = vector.extract_strided_slice %38 {offsets = [0, 64], sizes = [8, 8], strides = [1, 1]} : vector<8x96xbf16> to vector<8x8xbf16>
    %58 = vector.extract_strided_slice %38 {offsets = [0, 72], sizes = [8, 8], strides = [1, 1]} : vector<8x96xbf16> to vector<8x8xbf16>
    %59 = vector.extract_strided_slice %38 {offsets = [0, 80], sizes = [8, 8], strides = [1, 1]} : vector<8x96xbf16> to vector<8x8xbf16>
    %60 = vector.extract_strided_slice %38 {offsets = [0, 88], sizes = [8, 8], strides = [1, 1]} : vector<8x96xbf16> to vector<8x8xbf16>
    %61 = vector.shape_cast %57 : vector<8x8xbf16> to vector<1x8x8xbf16>
    %62 = vector.shape_cast %58 : vector<8x8xbf16> to vector<1x8x8xbf16>
    %63 = vector.shape_cast %59 : vector<8x8xbf16> to vector<1x8x8xbf16>
    %64 = vector.shape_cast %60 : vector<8x8xbf16> to vector<1x8x8xbf16>
    %65 = tpu.concatenate %61, %62, %63, %64 in 0 : vector<1x8x8xbf16>, vector<1x8x8xbf16>, vector<1x8x8xbf16>, vector<1x8x8xbf16> -> vector<4x8x8xbf16>
    "tpu.trace_start"() <{level = 10 : i32, message = "hqd,hkd->hqk"}> : () -> ()
    %cst_16 = arith.constant dense<0.000000e+00> : vector<4x8x8xf32>
    %66 = tpu.matmul %47, %56, %cst_16 {dimension_numbers = #tpu.dot_dimension_numbers<[2], [2], [1], [1], [0, 0, 0, 1, 1, 1], [0], [0]>} : vector<4x8x8xbf16>, vector<4x8x8xbf16>, vector<4x8x8xf32> -> vector<4x8x8xf32>
    "tpu.trace_stop"() : () -> ()
    %67 = tpu.iota {dimensions = array<i32: 2>} : vector<1x1x8xi32>
    %c5_i32 = arith.constant 5 : i32
    %68 = vector.broadcast %c5_i32 : i32 to vector<1x1x8xi32>
    %69 = arith.cmpi slt, %67, %68 : vector<1x1x8xi32>
    %cst_17 = arith.constant 0.000000e+00 : f32
    %cst_18 = arith.constant -1.000000e+09 : f32
    %70 = vector.broadcast %cst_17 : f32 to vector<1x1x8xf32>
    %71 = vector.broadcast %cst_18 : f32 to vector<1x1x8xf32>
    %72 = arith.select %69, %70, %71 : vector<1x1x8xi1>, vector<1x1x8xf32>
    %c0_19 = arith.constant 0 : index
    %c0_20 = arith.constant 0 : index
    %c0_21 = arith.constant 0 : index
    %c0_22 = arith.constant 0 : index
    %73 = vector.load %arg11[%c0_19, %c0_20, %c0_21, %c0_22] : memref<1x4x8x8xf32, #tpu.memory_space<vmem>>, vector<1x4x8x8xf32>
    %74 = vector.shape_cast %73 : vector<1x4x8x8xf32> to vector<4x8x8xf32>
    %75 = arith.addf %66, %74 : vector<4x8x8xf32>
    %76 = vector.broadcast %72 : vector<1x1x8xf32> to vector<4x8x8xf32>
    %77 = arith.addf %75, %76 : vector<4x8x8xf32>
    %cst_23 = arith.constant dense<0xFF800000> : vector<4x8xf32>
    %78 = vector.multi_reduction <maximumf>, %77, %cst_23 [2] : vector<4x8x8xf32> to vector<4x8xf32>
    %79 = vector.shape_cast %78 : vector<4x8xf32> to vector<4x8x1xf32>
    %80 = vector.broadcast %79 : vector<4x8x1xf32> to vector<4x8x8xf32>
    %81 = arith.subf %77, %80 : vector<4x8x8xf32>
    %82 = math.exp %81 : vector<4x8x8xf32>
    %cst_24 = arith.constant dense<0.000000e+00> : vector<4x8xf32>
    %83 = vector.multi_reduction <add>, %82, %cst_24 [2] : vector<4x8x8xf32> to vector<4x8xf32>
    %84 = vector.shape_cast %83 : vector<4x8xf32> to vector<4x8x1xf32>
    %85 = tpu.reciprocal %84 {approx = true} : vector<4x8x1xf32> -> vector<4x8x1xf32>
    %86 = vector.broadcast %85 : vector<4x8x1xf32> to vector<4x8x8xf32>
    %87 = arith.mulf %82, %86 : vector<4x8x8xf32>
    %88 = arith.truncf %87 : vector<4x8x8xf32> to vector<4x8x8xbf16>
    "tpu.trace_start"() <{level = 10 : i32, message = "hqk,hkd->hqd"}> : () -> ()
    %cst_25 = arith.constant dense<0.000000e+00> : vector<4x8x8xf32>
    %89 = tpu.matmul %88, %65, %cst_25 {dimension_numbers = #tpu.dot_dimension_numbers<[2], [1], [1], [2], [0, 0, 0, 1, 1, 2], [0], [0]>} : vector<4x8x8xbf16>, vector<4x8x8xbf16>, vector<4x8x8xf32> -> vector<4x8x8xf32>
    "tpu.trace_stop"() : () -> ()
    %90 = vector.extract_strided_slice %89 {offsets = [0, 0, 0], sizes = [1, 8, 8], strides = [1, 1, 1]} : vector<4x8x8xf32> to vector<1x8x8xf32>
    %91 = vector.shape_cast %90 : vector<1x8x8xf32> to vector<8x8xf32>
    %92 = vector.extract_strided_slice %89 {offsets = [1, 0, 0], sizes = [1, 8, 8], strides = [1, 1, 1]} : vector<4x8x8xf32> to vector<1x8x8xf32>
    %93 = vector.shape_cast %92 : vector<1x8x8xf32> to vector<8x8xf32>
    %94 = vector.extract_strided_slice %89 {offsets = [2, 0, 0], sizes = [1, 8, 8], strides = [1, 1, 1]} : vector<4x8x8xf32> to vector<1x8x8xf32>
    %95 = vector.shape_cast %94 : vector<1x8x8xf32> to vector<8x8xf32>
    %96 = vector.extract_strided_slice %89 {offsets = [3, 0, 0], sizes = [1, 8, 8], strides = [1, 1, 1]} : vector<4x8x8xf32> to vector<1x8x8xf32>
    %97 = vector.shape_cast %96 : vector<1x8x8xf32> to vector<8x8xf32>
    %98 = tpu.concatenate %91, %93, %95, %97 in 1 : vector<8x8xf32>, vector<8x8xf32>, vector<8x8xf32>, vector<8x8xf32> -> vector<8x32xf32>
    %99 = arith.truncf %98 : vector<8x32xf32> to vector<8x32xbf16>
    %c0_26 = arith.constant 0 : index
    %c0_27 = arith.constant 0 : index
    %c0_28 = arith.constant 0 : index
    %100 = vector.load %arg6[%c0_26, %c0_27, %c0_28] : memref<1x32x32xbf16, #tpu.memory_space<vmem>>, vector<1x32x32xbf16>
    %101 = vector.shape_cast %100 : vector<1x32x32xbf16> to vector<32x32xbf16>
    %cst_29 = arith.constant dense<0.000000e+00> : vector<8x32xf32>
    %102 = tpu.matmul %99, %101, %cst_29 {dimension_numbers = #tpu.dot_dimension_numbers<[1], [0], [0], [1], [0, 0, 1, 1], [], []>} : vector<8x32xbf16>, vector<32x32xbf16>, vector<8x32xf32> -> vector<8x32xf32>
    %103 = vector.extract_strided_slice %5 {offsets = [6, 0], sizes = [1, 32], strides = [1, 1]} : vector<8x32xf32> to vector<1x32xf32>
    %104 = vector.broadcast %103 : vector<1x32xf32> to vector<8x32xf32>
    %105 = arith.addf %102, %104 : vector<8x32xf32>
    %106 = vector.extract_strided_slice %5 {offsets = [2, 0], sizes = [1, 32], strides = [1, 1]} : vector<8x32xf32> to vector<1x32xf32>
    %107 = vector.broadcast %106 : vector<1x32xf32> to vector<8x32xf32>
    %108 = arith.mulf %107, %105 : vector<8x32xf32>
    %109 = arith.addf %3, %108 : vector<8x32xf32>
    %110 = vector.extract_strided_slice %5 {offsets = [3, 0], sizes = [1, 32], strides = [1, 1]} : vector<8x32xf32> to vector<1x32xf32>
    %111 = vector.extract_strided_slice %5 {offsets = [4, 0], sizes = [1, 32], strides = [1, 1]} : vector<8x32xf32> to vector<1x32xf32>
    %cst_30 = arith.constant dense<0.000000e+00> : vector<8xf32>
    %112 = vector.multi_reduction <add>, %109, %cst_30 [1] : vector<8x32xf32> to vector<8xf32>
    %113 = vector.shape_cast %112 : vector<8xf32> to vector<8x1xf32>
    %cst_31 = arith.constant 3.200000e+01 : f32
    %114 = vector.broadcast %cst_31 : f32 to vector<8x1xf32>
    %115 = arith.divf %113, %114 : vector<8x1xf32>
    %116 = vector.broadcast %115 : vector<8x1xf32> to vector<8x32xf32>
    %117 = arith.subf %109, %116 : vector<8x32xf32>
    %118 = arith.mulf %117, %117 : vector<8x32xf32>
    %cst_32 = arith.constant dense<0.000000e+00> : vector<8xf32>
    %119 = vector.multi_reduction <add>, %118, %cst_32 [1] : vector<8x32xf32> to vector<8xf32>
    %120 = vector.shape_cast %119 : vector<8xf32> to vector<8x1xf32>
    %cst_33 = arith.constant 3.200000e+01 : f32
    %121 = vector.broadcast %cst_33 : f32 to vector<8x1xf32>
    %122 = arith.divf %120, %121 : vector<8x1xf32>
    %123 = vector.broadcast %115 : vector<8x1xf32> to vector<8x32xf32>
    %124 = arith.subf %109, %123 : vector<8x32xf32>
    %cst_34 = arith.constant 9.99999996E-13 : f32
    %125 = vector.broadcast %cst_34 : f32 to vector<8x1xf32>
    %126 = arith.addf %122, %125 : vector<8x1xf32>
    %127 = math.rsqrt %126 : vector<8x1xf32>
    %128 = vector.broadcast %127 : vector<8x1xf32> to vector<8x32xf32>
    %129 = arith.mulf %124, %128 : vector<8x32xf32>
    %130 = vector.broadcast %110 : vector<1x32xf32> to vector<8x32xf32>
    %131 = arith.mulf %129, %130 : vector<8x32xf32>
    %132 = vector.broadcast %111 : vector<1x32xf32> to vector<8x32xf32>
    %133 = arith.addf %131, %132 : vector<8x32xf32>
    %134 = arith.truncf %133 : vector<8x32xf32> to vector<8x32xbf16>
    %c0_35 = arith.constant 0 : index
    %c0_36 = arith.constant 0 : index
    %c0_37 = arith.constant 0 : index
    %135 = vector.load %arg7[%c0_35, %c0_36, %c0_37] : memref<1x32x128xbf16, #tpu.memory_space<vmem>>, vector<1x32x128xbf16>
    %136 = vector.shape_cast %135 : vector<1x32x128xbf16> to vector<32x128xbf16>
    %cst_38 = arith.constant dense<0.000000e+00> : vector<8x128xf32>
    %137 = tpu.matmul %134, %136, %cst_38 {dimension_numbers = #tpu.dot_dimension_numbers<[1], [0], [0], [1], [0, 0, 1, 1], [], []>} : vector<8x32xbf16>, vector<32x128xbf16>, vector<8x128xf32> -> vector<8x128xf32>
    %c0_39 = arith.constant 0 : index
    %c0_40 = arith.constant 0 : index
    %c0_41 = arith.constant 0 : index
    %138 = vector.load %arg8[%c0_39, %c0_40, %c0_41] : memref<1x1x128xf32, #tpu.memory_space<vmem>>, vector<1x1x128xf32>
    %139 = vector.shape_cast %138 : vector<1x1x128xf32> to vector<1x128xf32>
    %140 = vector.broadcast %139 : vector<1x128xf32> to vector<8x128xf32>
    %141 = arith.addf %137, %140 : vector<8x128xf32>
    %cst_42 = arith.constant 5.000000e-01 : f32
    %142 = vector.broadcast %cst_42 : f32 to vector<8x128xf32>
    %143 = arith.mulf %142, %141 : vector<8x128xf32>
    %cst_43 = arith.constant 0.707106769 : f32
    %144 = vector.broadcast %cst_43 : f32 to vector<8x128xf32>
    %145 = arith.mulf %141, %144 : vector<8x128xf32>
    %146 = math.erf %145 : vector<8x128xf32>
    %cst_44 = arith.constant 1.000000e+00 : f32
    %147 = vector.broadcast %cst_44 : f32 to vector<8x128xf32>
    %148 = arith.addf %147, %146 : vector<8x128xf32>
    %149 = arith.mulf %143, %148 : vector<8x128xf32>
    %150 = arith.truncf %149 : vector<8x128xf32> to vector<8x128xbf16>
    %c0_45 = arith.constant 0 : index
    %c0_46 = arith.constant 0 : index
    %c0_47 = arith.constant 0 : index
    %151 = vector.load %arg9[%c0_45, %c0_46, %c0_47] : memref<1x128x32xbf16, #tpu.memory_space<vmem>>, vector<1x128x32xbf16>
    %152 = vector.shape_cast %151 : vector<1x128x32xbf16> to vector<128x32xbf16>
    %cst_48 = arith.constant dense<0.000000e+00> : vector<8x32xf32>
    %153 = tpu.matmul %150, %152, %cst_48 {dimension_numbers = #tpu.dot_dimension_numbers<[1], [0], [0], [1], [0, 0, 1, 1], [], []>} : vector<8x128xbf16>, vector<128x32xbf16>, vector<8x32xf32> -> vector<8x32xf32>
    %154 = vector.extract_strided_slice %5 {offsets = [7, 0], sizes = [1, 32], strides = [1, 1]} : vector<8x32xf32> to vector<1x32xf32>
    %155 = vector.broadcast %154 : vector<1x32xf32> to vector<8x32xf32>
    %156 = arith.addf %153, %155 : vector<8x32xf32>
    %157 = vector.extract_strided_slice %5 {offsets = [5, 0], sizes = [1, 32], strides = [1, 1]} : vector<8x32xf32> to vector<1x32xf32>
    %158 = vector.broadcast %157 : vector<1x32xf32> to vector<8x32xf32>
    %159 = arith.mulf %158, %156 : vector<8x32xf32>
    %160 = arith.addf %109, %159 : vector<8x32xf32>
    %c0_49 = arith.constant 0 : index
    %c0_50 = arith.constant 0 : index
    %161 = vector.load %arg18[%c0_49, %c0_50] : memref<8x32xf32, #tpu.memory_space<vmem>>, vector<8x32xf32>
    tpu.vector_store %arg18[%c0_49, %c0_50], %160 {strides = array<i32>} : memref<8x32xf32, #tpu.memory_space<vmem>>, vector<8x32xf32>,
    %c1_i32 = arith.constant 1 : i32
    %162 = arith.cmpi eq, %arg1, %c1_i32 : i32
    %163 = arith.extui %162 : i1 to i32
    %c0_i32_51 = arith.constant 0 : i32
    %164 = arith.cmpi ne, %163, %c0_i32_51 : i32
    scf.if %164 {
      %165 = tpu.iota {dimensions = array<i32: 0>} : vector<8x1xi32>
      %c1_i32_52 = arith.constant 1 : i32
      %166 = vector.broadcast %c1_i32_52 : i32 to vector<8x1xi32>
      %167 = arith.cmpi sge, %165, %166 : vector<8x1xi32>
      %c5_i32_53 = arith.constant 5 : i32
      %168 = vector.broadcast %c5_i32_53 : i32 to vector<8x1xi32>
      %169 = arith.cmpi slt, %165, %168 : vector<8x1xi32>
      %170 = arith.andi %167, %169 : vector<8x1xi1>
      %cst_54 = arith.constant 2.500000e-01 : f32
      %cst_55 = arith.constant 0.000000e+00 : f32
      %171 = vector.broadcast %cst_54 : f32 to vector<8x1xf32>
      %172 = vector.broadcast %cst_55 : f32 to vector<8x1xf32>
      %173 = arith.select %170, %171, %172 : vector<8x1xi1>, vector<8x1xf32>
      %174 = vector.broadcast %173 : vector<8x1xf32> to vector<8x32xf32>
      %175 = arith.mulf %160, %174 : vector<8x32xf32>
      %cst_56 = arith.constant dense<0.000000e+00> : vector<32xf32>
      %176 = vector.multi_reduction <add>, %175, %cst_56 [0] : vector<8x32xf32> to vector<32xf32>
      %177 = vector.shape_cast %176 : vector<32xf32> to vector<1x32xf32>
      %c0_57 = arith.constant 0 : index
      %c0_58 = arith.constant 0 : index
      %178 = vector.load %arg12[%c0_57, %c0_58] : memref<2x32xf32, #tpu.memory_space<vmem>>, vector<2x32xf32>
      %179 = vector.extract_strided_slice %178 {offsets = [0, 0], sizes = [1, 32], strides = [1, 1]} : vector<2x32xf32> to vector<1x32xf32>
      %180 = vector.extract_strided_slice %178 {offsets = [1, 0], sizes = [1, 32], strides = [1, 1]} : vector<2x32xf32> to vector<1x32xf32>
      %cst_59 = arith.constant dense<0.000000e+00> : vector<1xf32>
      %181 = vector.multi_reduction <add>, %177, %cst_59 [1] : vector<1x32xf32> to vector<1xf32>
      %182 = vector.shape_cast %181 : vector<1xf32> to vector<1x1xf32>
      %cst_60 = arith.constant 3.200000e+01 : f32
      %183 = vector.broadcast %cst_60 : f32 to vector<1x1xf32>
      %184 = arith.divf %182, %183 : vector<1x1xf32>
      %185 = vector.broadcast %184 : vector<1x1xf32> to vector<1x32xf32>
      %186 = arith.subf %177, %185 : vector<1x32xf32>
      %187 = arith.mulf %186, %186 : vector<1x32xf32>
      %cst_61 = arith.constant dense<0.000000e+00> : vector<1xf32>
      %188 = vector.multi_reduction <add>, %187, %cst_61 [1] : vector<1x32xf32> to vector<1xf32>
      %189 = vector.shape_cast %188 : vector<1xf32> to vector<1x1xf32>
      %cst_62 = arith.constant 3.200000e+01 : f32
      %190 = vector.broadcast %cst_62 : f32 to vector<1x1xf32>
      %191 = arith.divf %189, %190 : vector<1x1xf32>
      %192 = vector.broadcast %184 : vector<1x1xf32> to vector<1x32xf32>
      %193 = arith.subf %177, %192 : vector<1x32xf32>
      %cst_63 = arith.constant 9.99999996E-13 : f32
      %194 = vector.broadcast %cst_63 : f32 to vector<1x1xf32>
      %195 = arith.addf %191, %194 : vector<1x1xf32>
      %196 = math.rsqrt %195 : vector<1x1xf32>
      %197 = vector.broadcast %196 : vector<1x1xf32> to vector<1x32xf32>
      %198 = arith.mulf %193, %197 : vector<1x32xf32>
      %199 = arith.mulf %198, %179 : vector<1x32xf32>
      %200 = arith.addf %199, %180 : vector<1x32xf32>
      %201 = arith.truncf %200 : vector<1x32xf32> to vector<1x32xbf16>
      %c0_64 = arith.constant 0 : index
      %c0_65 = arith.constant 0 : index
      %202 = vector.load %arg13[%c0_64, %c0_65] : memref<32x128xbf16, #tpu.memory_space<vmem>>, vector<32x128xbf16>
      %cst_66 = arith.constant dense<0.000000e+00> : vector<1x128xf32>
      %203 = tpu.matmul %201, %202, %cst_66 {dimension_numbers = #tpu.dot_dimension_numbers<[1], [0], [0], [1], [0, 0, 1, 1], [], []>} : vector<1x32xbf16>, vector<32x128xbf16>, vector<1x128xf32> -> vector<1x128xf32>
      %c0_67 = arith.constant 0 : index
      %c0_68 = arith.constant 0 : index
      %204 = vector.load %arg14[%c0_67, %c0_68] : memref<1x128xf32, #tpu.memory_space<vmem>>, vector<1x128xf32>
      %205 = arith.addf %203, %204 : vector<1x128xf32>
      %206 = arith.truncf %205 : vector<1x128xf32> to vector<1x128xbf16>
      %c0_69 = arith.constant 0 : index
      %c0_70 = arith.constant 0 : index
      %207 = vector.load %arg15[%c0_69, %c0_70] : memref<128x128xbf16, #tpu.memory_space<vmem>>, vector<128x128xbf16>
      %cst_71 = arith.constant dense<0.000000e+00> : vector<1x128xf32>
      %208 = tpu.matmul %206, %207, %cst_71 {dimension_numbers = #tpu.dot_dimension_numbers<[1], [0], [0], [1], [0, 0, 1, 1], [], []>} : vector<1x128xbf16>, vector<128x128xbf16>, vector<1x128xf32> -> vector<1x128xf32>
      %c0_72 = arith.constant 0 : index
      %c0_73 = arith.constant 0 : index
      %209 = vector.load %arg16[%c0_72, %c0_73] : memref<1x128xf32, #tpu.memory_space<vmem>>, vector<1x128xf32>
      %210 = arith.addf %208, %209 : vector<1x128xf32>
      %211 = vector.shape_cast %210 : vector<1x128xf32> to vector<1x128xf32>
      %212 = vector.broadcast %211 : vector<1x128xf32> to vector<8x128xf32>
      %c0_74 = arith.constant 0 : index
      %c0_75 = arith.constant 0 : index
      %c0_76 = arith.constant 0 : index
      %213 = vector.load %arg17[%c0_74, %c0_75, %c0_76] : memref<1x8x128xf32, #tpu.memory_space<vmem>>, vector<1x8x128xf32>
      %214 = vector.shape_cast %213 : vector<1x8x128xf32> to vector<8x128xf32>
      %215 = vector.shape_cast %212 : vector<8x128xf32> to vector<1x8x128xf32>
      tpu.vector_store %arg17[%c0_74, %c0_75, %c0_76], %215 {strides = array<i32>} : memref<1x8x128xf32, #tpu.memory_space<vmem>>, vector<1x8x128xf32>,
    } else {
    }
    return
  }
  func.func @transform_0(%arg0: i32, %arg1: i32) -> (i32, i32, i32) {
    %c0_i32 = arith.constant 0 : i32
    %c0_i32_0 = arith.constant 0 : i32
    %c0_i32_1 = arith.constant 0 : i32
    return %arg0, %c0_i32, %c0_i32_0 : i32, i32, i32
  }
  func.func @transform_1(%arg0: i32, %arg1: i32) -> (i32, i32) {
    %c0_i32 = arith.constant 0 : i32
    %c0_i32_0 = arith.constant 0 : i32
    %c0_i32_1 = arith.constant 0 : i32
    return %c0_i32, %c0_i32_0 : i32, i32
  }
  func.func @transform_2(%arg0: i32, %arg1: i32) -> (i32, i32, i32) {
    %c0_i32 = arith.constant 0 : i32
    %c0_i32_0 = arith.constant 0 : i32
    %c0_i32_1 = arith.constant 0 : i32
    return %arg1, %c0_i32, %c0_i32_0 : i32, i32, i32
  }
  func.func @transform_3(%arg0: i32, %arg1: i32) -> (i32, i32, i32) {
    %c0_i32 = arith.constant 0 : i32
    %c0_i32_0 = arith.constant 0 : i32
    %c0_i32_1 = arith.constant 0 : i32
    return %arg1, %c0_i32, %c0_i32_0 : i32, i32, i32
  }
  func.func @transform_4(%arg0: i32, %arg1: i32) -> (i32, i32, i32) {
    %c0_i32 = arith.constant 0 : i32
    %c0_i32_0 = arith.constant 0 : i32
    %c0_i32_1 = arith.constant 0 : i32
    return %arg1, %c0_i32, %c0_i32_0 : i32, i32, i32
  }
  func.func @transform_5(%arg0: i32, %arg1: i32) -> (i32, i32, i32) {
    %c0_i32 = arith.constant 0 : i32
    %c0_i32_0 = arith.constant 0 : i32
    %c0_i32_1 = arith.constant 0 : i32
    return %arg1, %c0_i32, %c0_i32_0 : i32, i32, i32
  }
  func.func @transform_6(%arg0: i32, %arg1: i32) -> (i32, i32, i32) {
    %c0_i32 = arith.constant 0 : i32
    %c0_i32_0 = arith.constant 0 : i32
    %c0_i32_1 = arith.constant 0 : i32
    return %arg1, %c0_i32, %c0_i32_0 : i32, i32, i32
  }
  func.func @transform_7(%arg0: i32, %arg1: i32) -> (i32, i32, i32) {
    %c0_i32 = arith.constant 0 : i32
    %c0_i32_0 = arith.constant 0 : i32
    %c0_i32_1 = arith.constant 0 : i32
    return %arg1, %c0_i32, %c0_i32_0 : i32, i32, i32
  }
  func.func @transform_8(%arg0: i32, %arg1: i32) -> (i32, i32, i32) {
    %c0_i32 = arith.constant 0 : i32
    %c0_i32_0 = arith.constant 0 : i32
    %c0_i32_1 = arith.constant 0 : i32
    return %arg1, %c0_i32, %c0_i32_0 : i32, i32, i32
  }
  func.func @transform_9(%arg0: i32, %arg1: i32) -> (i32, i32, i32, i32) {
    %c0_i32 = arith.constant 0 : i32
    %c0_i32_0 = arith.constant 0 : i32
    %c0_i32_1 = arith.constant 0 : i32
    %c0_i32_2 = arith.constant 0 : i32
    return %arg1, %c0_i32, %c0_i32_0, %c0_i32_1 : i32, i32, i32, i32
  }
  func.func @transform_10(%arg0: i32, %arg1: i32) -> (i32, i32) {
    %c0_i32 = arith.constant 0 : i32
    %c0_i32_0 = arith.constant 0 : i32
    %c0_i32_1 = arith.constant 0 : i32
    return %c0_i32, %c0_i32_0 : i32, i32
  }
  func.func @transform_11(%arg0: i32, %arg1: i32) -> (i32, i32) {
    %c0_i32 = arith.constant 0 : i32
    %c0_i32_0 = arith.constant 0 : i32
    %c0_i32_1 = arith.constant 0 : i32
    return %c0_i32, %c0_i32_0 : i32, i32
  }
  func.func @transform_12(%arg0: i32, %arg1: i32) -> (i32, i32) {
    %c0_i32 = arith.constant 0 : i32
    %c0_i32_0 = arith.constant 0 : i32
    %c0_i32_1 = arith.constant 0 : i32
    return %c0_i32, %c0_i32_0 : i32, i32
  }
  func.func @transform_13(%arg0: i32, %arg1: i32) -> (i32, i32) {
    %c0_i32 = arith.constant 0 : i32
    %c0_i32_0 = arith.constant 0 : i32
    %c0_i32_1 = arith.constant 0 : i32
    return %c0_i32, %c0_i32_0 : i32, i32
  }
  func.func @transform_14(%arg0: i32, %arg1: i32) -> (i32, i32) {
    %c0_i32 = arith.constant 0 : i32
    %c0_i32_0 = arith.constant 0 : i32
    %c0_i32_1 = arith.constant 0 : i32
    return %c0_i32, %c0_i32_0 : i32, i32
  }
  func.func @transform_15(%arg0: i32, %arg1: i32) -> (i32, i32, i32) {
    %c0_i32 = arith.constant 0 : i32
    %c0_i32_0 = arith.constant 0 : i32
    %c0_i32_1 = arith.constant 0 : i32
    return %arg0, %c0_i32, %c0_i32_0 : i32, i32, i32
  }
}

</mosaic_0001>

<bundles_post_ra>
// kernel: beit_forward.1
= control target key start
LH: loop header
LB: loop body
LE: loop exit
PB: predicated region body
PF: predicated region fallthrough
CT: control target
= control target key end

     0   :  { %s2567_s18 = smov 0   ;;  %s2569_s19 = smov 0   ;;  %s2936_s0 = inlined_call_operand.vmem [shape: bf16[2,8,256], index: 0, kind: input, shape index: {}]   ;;  %s2937_s1 = inlined_call_operand.vmem [shape: bf16[256,32], index: 1, kind: input, shape index: {}]   ;;  %s2938_s2 = inlined_call_operand.vmem [shape: bf16[2,32,96], index: 2, kind: input, shape index: {}]   ;;  %s2939_s3 = inlined_call_operand.vmem [shape: f32[2,1,96], index: 3, kind: input, shape index: {}]   ;;  %s2940_s4 = inlined_call_operand.vmem [shape: bf16[2,32,32], index: 4, kind: input, shape index: {}]   ;;  %s2941_s5 = inlined_call_operand.vmem [shape: bf16[2,32,128], index: 5, kind: input, shape index: {}]   ;;  %s2942_s6 = inlined_call_operand.vmem [shape: f32[2,1,128], index: 6, kind: input, shape index: {}]   ;;  %s2943_s7 = inlined_call_operand.vmem [shape: bf16[2,128,32], index: 7, kind: input, shape index: {}]   ;;  %s2944_s8 = inlined_call_operand.vmem [shape: f32[2,8,32], index: 8, kind: input, shape index: {}]   ;;  %s2945_s9 = inlined_call_operand.vmem [shape: f32[2,4,8,8], index: 9, kind: input, shape index: {}]   ;;  %s2946_s10 = inlined_call_operand.vmem [shape: f32[2,32], index: 10, kind: input, shape index: {}]   ;;  %s2947_s11 = inlined_call_operand.vmem [shape: bf16[32,128], index: 11, kind: input, shape index: {}]   ;;  %s2948_s12 = inlined_call_operand.vmem [shape: f32[1,128], index: 12, kind: input, shape index: {}]   ;;  %s2949_s13 = inlined_call_operand.vmem [shape: bf16[128,128], index: 13, kind: input, shape index: {}]   ;;  %s2950_s14 = inlined_call_operand.vmem [shape: f32[1,128], index: 14, kind: input, shape index: {}]   ;;  %s2951_s15 = inlined_call_operand.vmem [shape: f32[2,8,128], index: 15, kind: output, shape index: {}]  }
   0x1   :  { %2956 = sst [smem:[#allocation8_spill]] %s2936_s0  ;;  %s2571_s20 = smov 0  }
   0x2   :  { %2957 = sst [smem:[#allocation9_spill]] %s2938_s2  ;;  %s2573_s21 = smov 0  }
   0x3   :  { %2958 = sst [smem:[#allocation10_spill]] %s2940_s4  ;;  %s2575_s22 = smov 0  }
   0x4   :  { %2959 = sst [smem:[#allocation11_spill]] %s2946_s10 }
   0x5   :  { %2960 = sst [smem:[#allocation12_spill]] %s2948_s12 }
   0x6   :  { %2961 = sst [smem:[#allocation13_spill]] %s2949_s13 }
   0x7   :  { %2962 = sst [smem:[#allocation14_spill]] %s2950_s14 }
   0x8 LB: > { %2963 = sst [smem:[#allocation3_spill]] %s2464_s20  ;;  %s34_s23 = sadd.s32 1, %s2464_s20  ;;  %s2472_s22 = sphi %s2575_s22, %s25_s22   ;;  %s2468_s21 = sphi %s2573_s21, %s2981_s21   ;;  %s2464_s20 = sphi %s2571_s20, %s2980_s20   ;;  %s2460_s19 = sphi %s2569_s19, %s2979_s19   ;;  %s2456_s18 = sphi %s2567_s18, %s2978_s18  }
   0x9   : > { %2964 = sst [smem:[#allocation4_spill]] %s2468_s21  ;;  %s37_s24 = sadd.s32 1, %s2468_s21 }
   0xa   : > { %2965 = sst [smem:[#allocation5_spill]] %s2472_s22  ;;  %p35_p0 = scmp.ge.s32.totalorder %s34_s23, 2 }
   0xb   : > { %p2046_p1 = scmp.ge.s32.totalorder %s2472_s22, 1  ;;  %p524_p2 = scmp.lt.s32.totalorder %s2472_s22, 5 }
   0xc   : > { %s2983_s23 = smov (%p35_p0, %s34_s23), 0  ;;  %s2985_s24 = smov (!%p35_p0, %s37_s24), %s2468_s21 }
   0xd   : > { %2966 = sst [smem:[#allocation6_spill]] %s2983_s23  ;;  %p525_p3 = pnand %p2046_p1, %p524_p2 }
   0xe   : > { %p39_p4 = scmp.ge.s32.totalorder %s2985_s24, 2  ;;  %p606_p5 = scmp.lt.s32.totalorder (!%p525_p3), %s2460_s19, 1 }
   0xf   : > { %528 = sbr.rel (%p525_p3) target bundleno = 3497 (0xda9), region = 80  ;;  %p611_p6 = scmp.lt.s32.totalorder (!%p525_p3), %s2456_s18, 1 }
  0x10   : > { %s2987_s24 = smov (%p39_p4, %s2985_s24), 0  ;;  %s2968_s0 = sld [smem:[#allocation8_spill]] (!%p525_p3) }
  0x11   : > { %2967 = sst [smem:[#allocation7_spill]] %s2987_s24  ;;  %p2061_p7 = scmp.ne.s32.totalorder (!%p525_p3), %s2456_s18, 0 }
  0x12   : > { %s2969_s2 = sld [smem:[#allocation9_spill]] (!%p525_p3) }
  0x13   : > { %s2970_s4 = sld [smem:[#allocation10_spill]] (!%p525_p3) }
  0x14   : > { %s2989_s19 = smov (!%p606_p5, %s2460_s19), 1 }
  0x15   : > { %s2601_s25 = scalar_select %p611_p6, %s2456_s18, 1 }
  0x16   : > { %s2121_s26 = sshll.u32 %s2989_s19, 3 }
  0x17   : > { %s2606_s29 = scalar_lea.vmem %s2968_s0, %s2121_s26  ;;  %s2122_s30 = sshll.u32 %s2601_s25, 4 }
  0x18   : > { %s2612_s24 = scalar_lea.vmem %s2969_s2, %s2122_s30  ;;  %s2626_s27 = scalar_lea.vmem %s2941_s5, %s2122_s30 }
  0x19   : > { %s2621_s12 = scalar_lea.vmem %s2970_s4, %s2122_s30  ;;  %s2125_s17 = sshll.u32 %s2601_s25, 6 }
  0x1a   : > { %s2636_s21 = scalar_lea.vmem %s2943_s7, %s2125_s17  ;;  %s2057_s23 = sshll.u32 %s2601_s25, 3 }
  0x1b   : > { %s2642_s22 = scalar_lea.vmem %s2944_s8, %s2057_s23  ;;  %s2126_s4 = sshll.u32 %s2601_s25, 5 }
  0x1c   : > { %s2648_s19 = scalar_lea.vmem %s2945_s9, %s2126_s4  ;;  %s2653_s16 = scalar_lea.vmem %s2951_s15, %s2121_s26 }
  0x1d   : > { %654 = sbr.rel (%p2061_p7) target bundleno = 266 (0x10a), region = 84 }
  0x22   : > { %v2368_v0 = vld [vmem:[%s2937_s1 + $0x78] sm:$0xff]   ;;  %v2370_v2 = vld [vmem:[%s2937_s1 + $0x70] sm:$0xff]   ;;  %v2372_v4 = vld [vmem:[%s2937_s1 + $0x68] sm:$0xff]   ;;  %vm831_vm0 = vcmask 261120  }
  0x23   : > { %v2369_v1 = vld [vmem:[%s2937_s1 + $0x38] sm:$0xff]   ;;  %2127 = vmatprep.subr.bf16.mxu0 %v2368_v0  ;;  %v2371_v3 = vld [vmem:[%s2937_s1 + $0x30] sm:$0xff]   ;;  %v2373_v5 = vld [vmem:[%s2937_s1 + $0x28] sm:$0xff]  }
  0x24   : > { %2128 = vmatpush3.bf16.msra.mxu0 %v2369_v1  ;;  %v2374_v6 = vld [vmem:[%s2937_s1 + $0x60] sm:$0xff]   ;;  %v2376_v8 = vld [vmem:[%s2937_s1 + $0x58] sm:$0xff]   ;;  %v2378_v10 = vld [vmem:[%s2937_s1 + $0x50] sm:$0xff]  }
  0x25   : > { %2129 = vmatprep.subr.bf16.mxu0 %v2370_v2  ;;  %v2375_v7 = vld [vmem:[%s2937_s1 + $0x20] sm:$0xff]   ;;  %v2377_v9 = vld [vmem:[%s2937_s1 + $0x18] sm:$0xff]   ;;  %v2379_v13 = vld [vmem:[%s2937_s1 + $0x10] sm:$0xff]  }
  0x26   : > { %v655_v11 = vld [vmem:[%s2606_s29] sm:$0xff]  ;;  %v2380_v14 = vld [vmem:[%s2937_s1 + $0x48] sm:$0xff]  }
  0x27   : > { %v2063_v12 = vcombine.high %v655_v11, %v655_v11  ;;  %v2381_v15 = vld [vmem:[%s2937_s1 + $0x8] sm:$0xff]   ;;  %v2382_v16 = vld [vmem:[%s2937_s1 + $0x40] sm:$0xff]   ;;  %v2062_v18 = vcombine.low %v655_v11, %v655_v11 }
  0x28   : > { %2130 = vmatpush3.bf16.msra.mxu0 %v2371_v3  ;;  %v2383_v17 = vld [vmem:[%s2937_s1] sm:$0xff]  }
  0x29   : > { %2131 = vmatprep.subr.bf16.mxu0 %v2372_v4  ;;  %823 = vmatprep.mubr.bf16.mxu0 %v2063_v12 }
  0x2c   : > { %2132 = vmatpush3.bf16.msra.mxu0 %v2373_v5 }
  0x2d   : > { %2133 = vmatprep.subr.bf16.mxu0 %v2374_v6 }
  0x30   : > { %2134 = vmatpush3.bf16.msra.mxu0 %v2375_v7 }
  0x31   : > { %2135 = vmatprep.subr.bf16.mxu0 %v2376_v8 }
  0x34   : > { %2136 = vmatpush3.bf16.msra.mxu0 %v2377_v9 }
  0x35   : > { %2137 = vmatprep.subr.bf16.mxu0 %v2378_v10 }
  0x38   : > { %2138 = vmatpush3.bf16.msra.mxu0 %v2379_v13 }
  0x39   : > { %2139 = vmatprep.subr.bf16.mxu0 %v2380_v14 }
  0x3c   : > { %2140 = vmatpush3.bf16.msra.mxu0 %v2381_v15 }
  0x3d   : > { %2141 = vmatprep.subr.bf16.mxu0 %v2382_v16 }
  0x40   : > { %2142 = vmatpush3.bf16.msra.mxu0 %v2383_v17 }
  0x43   : > { %824 = vmatmul.mubr.bf16.vlgmr.msra.gmra.mxu0 %v2062_v18 }
 0x103   : > { %v2143_v19 = vpop.f32.mrf.mxu0 }
 0x105   : > { %v2144_v20 = vpop.f32.mrf.mxu0 }
 0x106   : > { %v2145_v21 = vadd.f32 %v2144_v20, %v2143_v19 }
 0x107   : > { %v2146_v22 = vpop.f32.mrf.mxu0 }
 0x108   : > { %832 = vst.msk [vmem:[#allocation2] sm:$0xff] %vm831_vm0, %v2145_v21 }
 0x109   : > { %v2147_v23 = vpop.f32.mrf.mxu0 }
 0x10a PF: > { %vm835_vm1 = vcmask 261120   ;;  %v2386_v31 = vld [vmem:[%s2612_s24 + $0x8] sm:$0xff]   ;;  %v2474_v32 = vmov 0.0   ;;  %vm2475_vm2 = vmmov 0   ;;  %v2387_v33 = vld [vmem:[%s2612_s24] sm:$0xff]   ;;  %v850_v37 = vlaneseq  ;;  %s2971_s26 = scalar_lea.vmem %s2939_s3, %s2601_s25  ;;  %s2476_s10 = smov 104  }
 0x10b   : > { %2195 = vmatprep.subr.bf16.mxu0 %v2474_v32  ;;  %2199 = vmatprep.mubr.msk.bf16.mxu0 %vm2475_vm2, %v2474_v32  ;;  %v2725_v40 = vld [vmem:[%s2642_s22] sm:$0xff]  ;;  %s2477_s30 = smov 120   ;;  %s2478_s0 = smov 112   ;;  %vm945_vm3 = vcmask 64512   ;;  %v2480_v6 = vmov -1e+09  }
 0x10c   : > { %2196 = vmatpush3.bf16.msra.mxu0 %v2386_v31  ;;  %2215 = vmatprep.subr.bf16.mxu1 %v2474_v32  ;;  %v2721_v38 = vshrl.u32 %v850_v37, 7  ;;  %v2080_v49 = vld [vmem:[%s2971_s26] ss:$0 sm:$0xff]  ;;  %s2479_s28 = smov 96   ;;  %v936_v3 = vand.u32 127, %v850_v37  ;;  %v940_v14 = vld [vmem:[%s2648_s19 + $0x8] sm:$0xff]  ;;  %s2972_s17 = scalar_lea.vmem %s2942_s6, %s2601_s25 }
 0x10d   : > { %2197 = vmatprep.subr.bf16.mxu0 %v2474_v32  ;;  %2217 = vmatprep.mubr.msk.bf16.mxu1 %vm2475_vm2, %v2474_v32  ;;  %v939_v4 = vld [vmem:[%s2648_s19] sm:$0xff]  ;;  %v941_v18 = vld [vmem:[%s2648_s19 + $0x10] sm:$0xff]  ;;  %s2481_s2 = smov 64   ;;  %vm1193_vm5 = vcmask 1043456   ;;  %s2483_s13 = smov 16   ;;  %vm1394_vm6 = vcmask 130048  }
 0x10e   : > { %v852_v39 = vsub.s32 0, %v2721_v38  ;;  %v857_v41 = vsub.s32 1, %v2721_v38  ;;  %vm937_vm4 = vcmp.lt.s32.totalorder %v936_v3, 5  ;;  %s2484_s20 = smov 24   ;;  %vm1396_vm7 = vcmask 195584   ;;  %p2107_p8 = scmp.ne.s32.totalorder %s2456_s18, 1 }
 0x10f   : > { %v2705_v24 = vld [vmem:[#allocation2] sm:$0xff]  ;;  %v938_v7 = vsel %vm937_vm4, 0.0, %v2480_v6  ;;  %s2973_s14 = sld [smem:[#allocation13_spill]] (!%p2107_p8) }
 0x110   : > { %v836_v25 = vsel %vm835_vm1, %v2705_v24, 0.0  ;;  %2198 = vmatpush3.bf16.msra.mxu0 %v2387_v33  ;;  %v853_v42 = vrot.slane %v2725_v40, %v852_v39  ;;  %v858_v45 = vrot.slane %v2725_v40, %v857_v41  ;;  %s2974_s18 = sld [smem:[#allocation11_spill]] (!%p2107_p8) }
 0x111   : > { %837 = vadd.xlane.f32.xlu0 %v836_v25  ;;  %2203 = vmatprep.subr.bf16.mxu0 %v2474_v32  ;;  %s2975_s4 = sld [smem:[#allocation12_spill]] (!%p2107_p8) }
 0x112   : > { %s2976_s26 = sld [smem:[#allocation14_spill]] (!%p2107_p8) }
 0x19a   : > { %v838_v26 = vpop.xlane.xlu0 %837 }
 0x19b   : > { %v840_v27 = vmul.f32 0.03125, %v838_v26 }
 0x19d   : > { %v841_v28 = vsub.f32 %v2705_v24, %v840_v27  ;;  %v942_v27 = vld [vmem:[%s2648_s19 + $0x18] sm:$0xff]  ;;  %s2482_s19 = smov 8  }
 0x19f   : > { %v842_v29 = vmul.f32 %v841_v28, %v841_v28 }
 0x1a1   : > { %v843_v30 = vsel %vm835_vm1, %v842_v29, 0.0 }
 0x1a2   : > { %844 = vadd.xlane.f32.xlu0 %v843_v30 }
 0x22b   : > { %v845_v34 = vpop.xlane.xlu0 %844 }
 0x22c   : > { %v846_v35 = vmul.f32 0.03125, %v845_v34 }
 0x22e   : > { %v847_v36 = vadd.f32 1e-12, %v846_v35 }
 0x230   : > { %2400 = vrsqrt.f32 %v847_v36 }
 0x23d   : > { %v2401_v43 = vpop.eup %2400 }
 0x23e   : > { %v849_v44 = vmul.f32 %v2401_v43, %v841_v28 }
 0x240   : > { %v854_v46 = vmul.f32 %v853_v42, %v849_v44 }
 0x242   : > { %v859_v47 = vadd.f32 %v858_v45, %v854_v46 }
 0x244   : > { %v860_v48 = vpack.c.bf16 %v859_v47, %v859_v47 }
 0x246   : > { %2200 = vmatmul.mubr.msk.bf16.vlgmr.msra.gmra.mxu0 %vm835_vm1, %v860_v48 }
 0x247   : > { %2205 = vmatprep.mubr.msk.bf16.mxu0 %vm2475_vm2, %v2474_v32 }
 0x306   : > { %v921_v50 = vpop.f32.mrf.mxu0 }
 0x307   : > { %v922_v51 = vadd.f32 %v2080_v49, %v921_v50 }
 0x308   : > { %v2201_v52 = vpop.f32.mrf.mxu0 }
 0x309   : > { %v2740_v53 = vpack.c.bf16 %v922_v51, %v922_v51 }
 0x30a   : > { %v924_v54 = vpop.f32.mrf.mxu0 }
 0x30b   : > { %933 = vrot.lane.b32.xlu0 %v2740_v53, %s2476_s10  ;;  %929 = vrot.lane.b32.xlu1 %v2740_v53, %s2477_s30 }
 0x30c   : > { %v2202_v55 = vpop.f32.mrf.mxu0 }
 0x30f   : > { %931 = vrot.lane.b32.xlu1 %v2740_v53, %s2478_s0 }
 0x313   : > { %943 = vrot.lane.b32.xlu1 %v2740_v53, %s2479_s28 }
 0x37d   : > { %v2746_v56 = vpop.permute.xlu1 %929  ;;  %v2752_v58 = vpop.permute.xlu0 %933 }
 0x37e   : > { %992 = vrot.lane.b32.xlu1 %v2746_v56, %s2479_s28 }
 0x381   : > { %v2749_v57 = vpop.permute.xlu1 %931 }
 0x382   : > { %1040 = vrot.lane.b32.xlu1 %v2749_v57, %s2479_s28 }
 0x385   : > { %v944_v59 = vpop.permute.xlu1 %943 }
 0x386   : > { %v950_v60 = vsel %vm945_vm3, %v944_v59, 0  ;;  %1088 = vrot.lane.b32.xlu1 %v2752_v58, %s2479_s28 }
 0x387   : > { %2204 = vmatpush3.bf16.xpose.msra.mxu0 %v950_v60 }
 0x388   : > { %2209 = vmatprep.subr.bf16.mxu0 %v2474_v32 }
 0x38e   : > { %2206 = vmatmul.mubr.msk.bf16.vlgmr.msra.gmra.mxu0 %vm945_vm3, %v2740_v53 }
 0x38f   : > { %2211 = vmatprep.mubr.msk.bf16.mxu0 %vm2475_vm2, %v2474_v32 }
 0x3f0   : > { %v993_v61 = vpop.permute.xlu1 %992 }
 0x3f1   : > { %v998_v62 = vsel %vm945_vm3, %v993_v61, 0 }
 0x3f2   : > { %2210 = vmatpush3.bf16.xpose.msra.mxu0 %v998_v62 }
 0x3f3   : > { %2221 = vmatprep.subr.bf16.mxu0 %v2474_v32 }
 0x3f4   : > { %v1041_v63 = vpop.permute.xlu1 %1040 }
 0x3f5   : > { %v1046_v0 = vsel %vm945_vm3, %v1041_v63, 0 }
 0x3f6   : > { %2216 = vmatpush3.bf16.xpose.msra.mxu1 %v1046_v0 }
 0x3f7   : > { %2227 = vmatprep.subr.bf16.mxu1 %v2474_v32 }
 0x3f8   : > { %v1089_v1 = vpop.permute.xlu1 %1088 }
 0x3f9   : > { %v1094_v2 = vsel %vm945_vm3, %v1089_v1, 0  ;;  %2212 = vmatmul.mubr.msk.bf16.vlgmr.msra.gmra.mxu0 %vm945_vm3, %v2746_v56 }
 0x3fa   : > { %2222 = vmatpush3.bf16.xpose.msra.mxu0 %v1094_v2  ;;  %2223 = vmatprep.mubr.msk.bf16.mxu0 %vm2475_vm2, %v2474_v32 }
 0x3fb   : > { %2233 = vmatprep.subr.bf16.mxu0 %v2474_v32 }
 0x3fd   : > { %2218 = vmatmul.mubr.msk.bf16.vlgmr.msra.gmra.mxu1 %vm945_vm3, %v2749_v57 }
 0x3fe   : > { %2229 = vmatprep.mubr.msk.bf16.mxu1 %vm2475_vm2, %v2474_v32 }
 0x401   : > { %2224 = vmatmul.mubr.msk.bf16.vlgmr.msra.gmra.mxu0 %vm945_vm3, %v2752_v58 }
 0x402   : > { %2235 = vmatprep.mubr.msk.bf16.mxu0 %vm2475_vm2, %v2474_v32 }
 0x44e   : > { %v986_v5 = vpop.f32.mrf.mxu0 }
 0x44f   : > { %v987_v8 = vadd.f32 %v986_v5, %v939_v4 }
 0x450   : > { %v2207_v9 = vpop.f32.mrf.mxu0 }
 0x451   : > { %v1136_v10 = vadd.f32 %v987_v8, %v938_v7 }
 0x452   : > { %v989_v11 = vpop.f32.mrf.mxu0 }
 0x453   : > { %v1140_v12 = vsel %vm945_vm3, %v1136_v10, -inf }
 0x454   : > { %1141 = vmax.xlane.f32.xlu1 %v1140_v12  ;;  %v2208_v13 = vpop.f32.mrf.mxu0 }
 0x4b9   : > { %v1034_v15 = vpop.f32.mrf.mxu0 }
 0x4ba   : > { %v1035_v16 = vadd.f32 %v1034_v15, %v940_v14 }
 0x4bb   : > { %v2213_v17 = vpop.f32.mrf.mxu0 }
 0x4bc   : > { %v1137_v19 = vadd.f32 %v1035_v16, %v938_v7 }
 0x4bd   : > { %v1037_v20 = vpop.f32.mrf.mxu0  ;;  %v1082_v21 = vpop.f32.mrf.mxu1 }
 0x4be   : > { %v1083_v22 = vadd.f32 %v1082_v21, %v941_v18  ;;  %v1143_v23 = vsel %vm945_vm3, %v1137_v19, -inf }
 0x4bf   : > { %v2219_v25 = vpop.f32.mrf.mxu1  ;;  %1144 = vmax.xlane.f32.xlu0 %v1143_v23  ;;  %v2214_v26 = vpop.f32.mrf.mxu0 }
 0x4c0   : > { %v1138_v28 = vadd.f32 %v1083_v22, %v938_v7 }
 0x4c1   : > { %v1085_v29 = vpop.f32.mrf.mxu1  ;;  %v1130_v30 = vpop.f32.mrf.mxu0 }
 0x4c2   : > { %v1131_v31 = vadd.f32 %v1130_v30, %v942_v27  ;;  %v1146_v33 = vsel %vm945_vm3, %v1138_v28, -inf  ;;  %v2389_v29 = vld [vmem:[%s2621_s12] sm:$0xff]  }
 0x4c3   : > { %v2220_v34 = vpop.f32.mrf.mxu1  ;;  %1147 = vmax.xlane.f32.xlu1 %v1146_v33  ;;  %v2225_v35 = vpop.f32.mrf.mxu0 }
 0x4c4   : > { %v1139_v36 = vadd.f32 %v1131_v31, %v938_v7 }
 0x4c5   : > { %v1133_v37 = vpop.f32.mrf.mxu0 }
 0x4c6   : > { %v1149_v41 = vsel %vm945_vm3, %v1139_v36, -inf }
 0x4c7   : > { %1150 = vmax.xlane.f32.xlu0 %v1149_v41  ;;  %v2226_v42 = vpop.f32.mrf.mxu0 }
 0x4d4   : > { %1188 = vrot.lane.b32.xlu1 %v2740_v53, %s2481_s2 }
 0x4dd   : > { %v1142_v43 = vpop.xlane.xlu1 %1141 }
 0x4de   : > { %v1152_v44 = vsub.f32 %v1136_v10, %v1142_v43 }
 0x4e0   : > { %v1156_v45 = vmul.f32 1.442695, %v1152_v44 }
 0x4e2   : > { %2402 = vpow2.f32 %v1156_v45 }
 0x4ef   : > { %v2403_v46 = vpop.eup %2402 }
 0x4f0   : > { %v1164_v47 = vsel %vm945_vm3, %v2403_v46, 0.0 }
 0x4f8   : > { %1165 = vadd.xlane.f32.xlu1 %v1164_v47 }
 0x548   : > { %v1145_v48 = vpop.xlane.xlu0 %1144 }
 0x549   : > { %v1153_v49 = vsub.f32 %v1137_v19, %v1145_v48 }
 0x54b   : > { %v1158_v50 = vmul.f32 1.442695, %v1153_v49 }
 0x54c   : > { %v1148_v51 = vpop.xlane.xlu1 %1147 }
 0x54d   : > { %2404 = vpow2.f32 %v1158_v50  ;;  %v1154_v52 = vsub.f32 %v1138_v28, %v1148_v51  ;;  %v2388_v28 = vld [vmem:[%s2621_s12 + $0x8] sm:$0xff]  }
 0x54f   : > { %v1160_v54 = vmul.f32 1.442695, %v1154_v52 }
 0x550   : > { %v1189_v55 = vpop.permute.xlu1 %1188  ;;  %v1151_v59 = vpop.xlane.xlu0 %1150 }
 0x551   : > { %2406 = vpow2.f32 %v1160_v54  ;;  %v1195_v53 = vsel %vm1193_vm5, %v1189_v55, 0  ;;  %v1155_v60 = vsub.f32 %v1139_v36, %v1151_v59  ;;  %v1405_v54 = vsub.s32 6, %v2721_v38 }
 0x552   : > { %2228 = vmatpush3.bf16.msra.mxu1 %v1195_v53  ;;  %v1464_v55 = vsub.s32 2, %v2721_v38 }
 0x553   : > { %v1162_v61 = vmul.f32 1.442695, %v1155_v60  ;;  %2239 = vmatprep.subr.bf16.mxu1 %v2474_v32  ;;  %v1406_v59 = vrot.slane %v2725_v40, %v1405_v54 }
 0x554   : > { %v1465_v53 = vrot.slane %v2725_v40, %v1464_v55 }
 0x555   : > { %2408 = vpow2.f32 %v1162_v61 }
 0x55a   : > { %v2405_v62 = vpop.eup %2404 }
 0x55b   : > { %v1167_v63 = vsel %vm945_vm3, %v2405_v62, 0.0 }
 0x55c   : > { %1168 = vadd.xlane.f32.xlu0 %v1167_v63 }
 0x55e   : > { %v2407_v0 = vpop.eup %2406 }
 0x55f   : > { %v1170_v1 = vsel %vm945_vm3, %v2407_v0, 0.0 }
 0x560   : > { %1171 = vadd.xlane.f32.xlu1 %v1170_v1 }
 0x562   : > { %v2409_v2 = vpop.eup %2408 }
 0x563   : > { %v1173_v3 = vsel %vm945_vm3, %v2409_v2, 0.0 }
 0x564   : > { %1174 = vadd.xlane.f32.xlu0 %v1173_v3 }
 0x571   : > { %1285 = vrot.lane.b32.xlu1 %v2749_v57, %s2481_s2 }
 0x575   : > { %1333 = vrot.lane.b32.xlu1 %v2752_v58, %s2481_s2 }
 0x57a   : > { %1237 = vrot.lane.b32.xlu0 %v2746_v56, %s2481_s2 }
 0x581   : > { %v1166_v4 = vpop.xlane.xlu1 %1165 }
 0x582   : > { %2410 = vrcp.f32 %v1166_v4 }
 0x58f   : > { %v2411_v5 = vpop.eup %2410 }
 0x590   : > { %v1180_v6 = vmul.f32 %v2411_v5, %v2403_v46 }
 0x592   : > { %v1184_v7 = vpack.c.bf16 %v1180_v6, %v1180_v6 }
 0x594   : > { %2230 = vmatmul.mubr.msk.bf16.vlgmr.msra.gmra.mxu1 %vm945_vm3, %v1184_v7 }
 0x595   : > { %2241 = vmatprep.mubr.msk.bf16.mxu1 %vm2475_vm2, %v2474_v32 }
 0x5e5   : > { %v1169_v8 = vpop.xlane.xlu0 %1168 }
 0x5e6   : > { %2412 = vrcp.f32 %v1169_v8 }
 0x5e9   : > { %v1172_v9 = vpop.xlane.xlu1 %1171 }
 0x5ea   : > { %2414 = vrcp.f32 %v1172_v9  ;;  %v2390_v9 = vld [vmem:[%s2626_s27 + $0x8] sm:$0xff]  }
 0x5ed   : > { %v1286_v57 = vpop.permute.xlu1 %1285  ;;  %v1175_v10 = vpop.xlane.xlu0 %1174 }
 0x5ee   : > { %v1291_v58 = vsel %vm1193_vm5, %v1286_v57, 0  ;;  %2416 = vrcp.f32 %v1175_v10  ;;  %v2391_v57 = vld [vmem:[%s2626_s27] sm:$0xff]   ;;  %v2393_v10 = vld [vmem:[%s2636_s21 + $0x30] sm:$0xff]  }
 0x5ef   : > { %2240 = vmatpush3.bf16.msra.mxu1 %v1291_v58 }
 0x5f0   : > { %2251 = vmatprep.subr.bf16.mxu1 %v2474_v32 }
 0x5f1   : > { %v1238_v56 = vpop.permute.xlu0 %1237  ;;  %v1334_v14 = vpop.permute.xlu1 %1333 }
 0x5f2   : > { %v1243_v11 = vsel %vm1193_vm5, %v1238_v56, 0  ;;  %v1339_v17 = vsel %vm1193_vm5, %v1334_v14, 0 }
 0x5f3   : > { %v2413_v12 = vpop.eup %2412  ;;  %2234 = vmatpush3.bf16.msra.mxu0 %v1243_v11 }
 0x5f4   : > { %2245 = vmatprep.subr.bf16.mxu0 %v2474_v32  ;;  %v1181_v13 = vmul.f32 %v2413_v12, %v2405_v62  ;;  %v1483_v12 = vsub.s32 3, %v2721_v38 }
 0x5f6   : > { %v1185_v15 = vpack.c.bf16 %v1181_v13, %v1181_v13  ;;  %v1488_v13 = vsub.s32 4, %v2721_v38  ;;  %v1484_v14 = vrot.slane %v2725_v40, %v1483_v12 }
 0x5f7   : > { %v2415_v16 = vpop.eup %2414 }
 0x5f8   : > { %2236 = vmatmul.mubr.msk.bf16.vlgmr.msra.gmra.mxu0 %vm945_vm3, %v1185_v15  ;;  %v1182_v18 = vmul.f32 %v2415_v16, %v2407_v0 }
 0x5f9   : > { %2246 = vmatpush3.bf16.msra.mxu0 %v1339_v17  ;;  %2247 = vmatprep.mubr.msk.bf16.mxu0 %vm2475_vm2, %v2474_v32  ;;  %v1489_v17 = vrot.slane %v2725_v40, %v1488_v13 }
 0x5fa   : > { %v1186_v19 = vpack.c.bf16 %v1182_v18, %v1182_v18  ;;  %2259 = vmatprep.subr.bf16.mxu0 %v2474_v32 }
 0x5fb   : > { %v2417_v20 = vpop.eup %2416 }
 0x5fc   : > { %2242 = vmatmul.mubr.msk.bf16.vlgmr.msra.gmra.mxu1 %vm945_vm3, %v1186_v19  ;;  %v1183_v21 = vmul.f32 %v2417_v20, %v2409_v2 }
 0x5fd   : > { %2255 = vmatprep.mubr.msk.bf16.mxu1 %vm2475_vm2, %v2474_v32  ;;  %2252 = vmatpush3.bf16.msra.mxu1 %v2388_v28  ;;  %v2095_v28 = vld [vmem:[%s2972_s17] ss:$0 sm:$0xff] }
 0x5fe   : > { %v1187_v22 = vpack.c.bf16 %v1183_v21, %v1183_v21  ;;  %2253 = vmatprep.subr.bf16.mxu1 %v2474_v32  ;;  %v2394_v21 = vld [vmem:[%s2636_s21 + $0x28] sm:$0xff]  }
 0x600   : > { %2248 = vmatmul.mubr.msk.bf16.vlgmr.msra.gmra.mxu0 %vm945_vm3, %v1187_v22  ;;  %v2395_v22 = vld [vmem:[%s2636_s21 + $0x20] sm:$0xff]  }
 0x601   : > { %2263 = vmatprep.mubr.msk.bf16.mxu0 %vm2475_vm2, %v2474_v32  ;;  %2254 = vmatpush3.bf16.msra.mxu1 %v2389_v29 }
 0x602   : > { %2267 = vmatprep.subr.bf16.mxu1 %v2474_v32  ;;  %2260 = vmatpush3.bf16.msra.mxu0 %v2390_v9 }
 0x603   : > { %2261 = vmatprep.subr.bf16.mxu0 %v2474_v32 }
 0x606   : > { %2262 = vmatpush3.bf16.msra.mxu0 %v2391_v57 }
 0x654   : > { %v1231_v23 = vpop.f32.mrf.mxu1 }
 0x656   : > { %v2231_v25 = vpop.f32.mrf.mxu1 }
 0x657   : > { %v2397_v25 = vld [vmem:[%s2636_s21 + $0x10] sm:$0xff]  }
 0x658   : > { %v1234_v26 = vpop.f32.mrf.mxu1 }
 0x659   : > { %v2398_v26 = vld [vmem:[%s2636_s21 + $0x8] sm:$0xff]  }
 0x65a   : > { %v2232_v27 = vpop.f32.mrf.mxu1 }
 0x65b   : > { %v2399_v27 = vld [vmem:[%s2636_s21] sm:$0xff]  }
 0x6b8   : > { %v1279_v30 = vpop.f32.mrf.mxu0 }
 0x6b9   : > { %1382 = vrot.lane.b32.xlu0 %v1279_v30, %s2482_s19 }
 0x6ba   : > { %v2237_v31 = vpop.f32.mrf.mxu0 }
 0x6bc   : > { %v1282_v33 = vpop.f32.mrf.mxu0  ;;  %v1327_v34 = vpop.f32.mrf.mxu1 }
 0x6bd   : > { %1386 = vrot.lane.b32.xlu1 %v1327_v34, %s2483_s13 }
 0x6be   : > { %v2238_v35 = vpop.f32.mrf.mxu0  ;;  %v2243_v36 = vpop.f32.mrf.mxu1 }
 0x6c0   : > { %v1330_v37 = vpop.f32.mrf.mxu1  ;;  %v1375_v41 = vpop.f32.mrf.mxu0 }
 0x6c1   : > { %1390 = vrot.lane.b32.xlu0 %v1375_v41, %s2484_s20 }
 0x6c2   : > { %v2244_v42 = vpop.f32.mrf.mxu1  ;;  %v2249_v43 = vpop.f32.mrf.mxu0 }
 0x6c4   : > { %v1378_v44 = vpop.f32.mrf.mxu0 }
 0x6c5   : > { %v1674_v44 = vsub.s32 5, %v2721_v38 }
 0x6c6   : > { %v2250_v45 = vpop.f32.mrf.mxu0 }
 0x72b   : > { %v1383_v46 = vpop.permute.xlu0 %1382 }
 0x72c   : > { %v1393_v48 = vsel %vm945_vm3, %v1231_v23, %v1383_v46  ;;  %v2396_v23 = vld [vmem:[%s2636_s21 + $0x18] sm:$0xff]   ;;  %v1675_v46 = vrot.slane %v2725_v40, %v1674_v44 }
 0x72f   : > { %v1387_v47 = vpop.permute.xlu1 %1386 }
 0x730   : > { %v1395_v49 = vsel %vm1394_vm6, %v1393_v48, %v1387_v47 }
 0x733   : > { %v1391_v50 = vpop.permute.xlu0 %1390 }
 0x734   : > { %v1397_v51 = vsel %vm1396_vm7, %v1395_v49, %v1391_v50 }
 0x735   : > { %v1398_v52 = vpack.c.bf16 %v1397_v51, %v1397_v51 }
 0x737   : > { %2256 = vmatmul.mubr.msk.bf16.vlgmr.msra.gmra.mxu1 %vm835_vm1, %v1398_v52 }
 0x738   : > { %2283 = vmatprep.mubr.msk.bf16.mxu1 %vm2475_vm2, %v2474_v32 }
 0x7f7   : > { %v1456_v60 = vpop.f32.mrf.mxu1 }
 0x7f8   : > { %v1457_v61 = vadd.f32 %v1456_v60, %v1406_v59 }
 0x7f9   : > { %v2257_v62 = vpop.f32.mrf.mxu1 }
 0x7fa   : > { %v1466_v63 = vmul.f32 %v1465_v53, %v1457_v61 }
 0x7fb   : > { %v1459_v0 = vpop.f32.mrf.mxu1 }
 0x7fc   : > { %v2832_v1 = vadd.f32 %v1466_v63, %v2705_v24  ;;  %v2392_v24 = vld [vmem:[%s2636_s21 + $0x38] sm:$0xff]  }
 0x7fd   : > { %v2258_v2 = vpop.f32.mrf.mxu1  ;;  %2268 = vmatpush3.bf16.msra.mxu1 %v2392_v24 }
 0x7fe   : > { %v1468_v3 = vsel %vm835_vm1, %v2832_v1, 0.0  ;;  %2269 = vmatprep.subr.bf16.mxu1 %v2474_v32 }
 0x7ff   : > { %1469 = vadd.xlane.f32.xlu1 %v1468_v3 }
 0x801   : > { %2270 = vmatpush3.bf16.msra.mxu1 %v2393_v10 }
 0x802   : > { %2271 = vmatprep.subr.bf16.mxu1 %v2474_v32 }
 0x805   : > { %2272 = vmatpush3.bf16.msra.mxu1 %v2394_v21 }
 0x806   : > { %2273 = vmatprep.subr.bf16.mxu1 %v2474_v32 }
 0x809   : > { %2274 = vmatpush3.bf16.msra.mxu1 %v2395_v22 }
 0x80a   : > { %2275 = vmatprep.subr.bf16.mxu1 %v2474_v32 }
 0x80d   : > { %2276 = vmatpush3.bf16.msra.mxu1 %v2396_v23 }
 0x80e   : > { %2277 = vmatprep.subr.bf16.mxu1 %v2474_v32 }
 0x811   : > { %2278 = vmatpush3.bf16.msra.mxu1 %v2397_v25 }
 0x812   : > { %2279 = vmatprep.subr.bf16.mxu1 %v2474_v32 }
 0x815   : > { %2280 = vmatpush3.bf16.msra.mxu1 %v2398_v26 }
 0x816   : > { %2281 = vmatprep.subr.bf16.mxu1 %v2474_v32  ;;  %v1582_v32 = vsub.s32 7, %v2721_v38 }
 0x818   : > { %v1583_v45 = vrot.slane %v2725_v40, %v1582_v32 }
 0x819   : > { %2282 = vmatpush3.bf16.msra.mxu1 %v2399_v27 }
 0x888   : > { %v1470_v4 = vpop.xlane.xlu1 %1469 }
 0x889   : > { %v1471_v5 = vmul.f32 0.03125, %v1470_v4 }
 0x88b   : > { %v1472_v6 = vsub.f32 %v2832_v1, %v1471_v5 }
 0x88d   : > { %v1473_v7 = vmul.f32 %v1472_v6, %v1472_v6 }
 0x88f   : > { %v1474_v8 = vsel %vm835_vm1, %v1473_v7, 0.0 }
 0x890   : > { %1475 = vadd.xlane.f32.xlu0 %v1474_v8 }
 0x919   : > { %v1476_v58 = vpop.xlane.xlu0 %1475 }
 0x91a   : > { %v1477_v56 = vmul.f32 0.03125, %v1476_v58 }
 0x91c   : > { %v1478_v11 = vadd.f32 1e-12, %v1477_v56 }
 0x91e   : > { %2418 = vrsqrt.f32 %v1478_v11 }
 0x92b   : > { %v2419_v15 = vpop.eup %2418 }
 0x92c   : > { %v1480_v16 = vmul.f32 %v2419_v15, %v1472_v6 }
 0x92e   : > { %v1485_v18 = vmul.f32 %v1484_v14, %v1480_v16 }
 0x930   : > { %v1490_v19 = vadd.f32 %v1489_v17, %v1485_v18 }
 0x932   : > { %v1491_v20 = vpack.c.bf16 %v1490_v19, %v1490_v19 }
 0x934   : > { %2264 = vmatmul.mubr.msk.bf16.vlgmr.msra.gmra.mxu0 %vm835_vm1, %v1491_v20 }
 0x9f4   : > { %v1552_v29 = vpop.f32.mrf.mxu0 }
 0x9f5   : > { %v1553_v30 = vadd.f32 %v2095_v28, %v1552_v29 }
 0x9f6   : > { %v2265_v31 = vpop.f32.mrf.mxu0 }
 0x9f7   : > { %v1559_v33 = vmul.f32 0.70710677, %v1553_v30  ;;  %v1558_v37 = vmul.f32 0.5, %v1553_v30 }
 0x9f8   : > { %v1555_v34 = vpop.f32.mrf.mxu0 }
 0x9f9   : > { %2420 = verf.f32 %v1559_v33 }
 0x9fa   : > { %v2266_v35 = vpop.f32.mrf.mxu0 }
 0xa06   : > { %v2421_v36 = vpop.eup %2420 }
 0xa07   : > { %v1561_v41 = vadd.f32 1.0, %v2421_v36 }
 0xa09   : > { %v1562_v42 = vmul.f32 %v1561_v41, %v1558_v37 }
 0xa0b   : > { %v1563_v43 = vpack.c.bf16 %v1562_v42, %v1562_v42 }
 0xa0d   : > { %2284 = vmatmul.mubr.bf16.vlgmr.msra.gmra.mxu1 %v1563_v43 }
 0xacd   : > { %v1666_v47 = vpop.f32.mrf.mxu1 }
 0xace   : > { %v1667_v48 = vadd.f32 %v1666_v47, %v1583_v45 }
 0xacf   : > { %v2285_v49 = vpop.f32.mrf.mxu1 }
 0xad0   : > { %v1676_v50 = vmul.f32 %v1675_v46, %v1667_v48  ;;  %1682 = sbr.rel (%p2107_p8) target bundleno = 3497 (0xda9), region = 88 }
 0xad1   : > { %v1669_v51 = vpop.f32.mrf.mxu1 }
 0xad2   : > { %v1677_v52 = vadd.f32 %v1676_v50, %v2832_v1 }
 0xad3   : > { %v2286_v54 = vpop.f32.mrf.mxu1 }
 0xad4   : > { %1678 = vst.msk [vmem:[#allocation2] sm:$0xff] %vm835_vm1, %v1677_v52 }
 0xad5   : > { %vm1685_vm8 = vcmp.ge.s32.totalorder %v2721_v38, 1  ;;  %vm1686_vm9 = vcmp.lt.s32.totalorder %v2721_v38, 5  ;;  %v2485_v55 = vmov 0.0   ;;  %v2422_v8 = vld [vmem:[%s2947_s11 + $0x8] sm:$0xff]   ;;  %vm2486_vm11 = vmmov 0   ;;  %v2423_v9 = vld [vmem:[%s2947_s11] sm:$0xff]  }
 0xad6   : > { %vm1687_vm10 = vmand %vm1685_vm8, %vm1686_vm9  ;;  %2287 = vmatprep.subr.bf16.mxu0 %v2485_v55  ;;  %2295 = vmatprep.subr.bf16.mxu1 %v2485_v55  ;;  %v2424_v57 = vld [vmem:[%s2973_s14 + $0x38] sm:$0xff]   ;;  %v2425_v24 = vld [vmem:[%s2973_s14 + $0x30] sm:$0xff]  }
 0xad7   : > { %v1688_v40 = vsel %vm1687_vm10, 0.25, %v2485_v55  ;;  %2291 = vmatprep.mubr.msk.bf16.mxu0 %vm2486_vm11, %v2485_v55  ;;  %2311 = vmatprep.mubr.msk.bf16.mxu1 %vm2486_vm11, %v2485_v55  ;;  %v2426_v10 = vld [vmem:[%s2973_s14 + $0x28] sm:$0xff]   ;;  %v2427_v58 = vld [vmem:[%s2973_s14 + $0x20] sm:$0xff]   ;;  %v2428_v56 = vld [vmem:[%s2973_s14 + $0x18] sm:$0xff]  }
 0xad8   : > { %v1689_v59 = vmul.f32 %v1688_v40, %v1677_v52  ;;  %2288 = vmatpush3.bf16.msra.mxu0 %v2422_v8  ;;  %2296 = vmatpush3.bf16.msra.mxu1 %v2424_v57  ;;  %v2429_v11 = vld [vmem:[%s2973_s14 + $0x10] sm:$0xff]   ;;  %v2430_v12 = vld [vmem:[%s2973_s14 + $0x8] sm:$0xff]   ;;  %v1697_v16 = vld [vmem:[%s2974_s18] sm:$0x3] }
 0xad9   : > { %2289 = vmatprep.subr.bf16.mxu0 %v2485_v55  ;;  %2297 = vmatprep.subr.bf16.mxu1 %v2485_v55  ;;  %v1713_v19 = vrot.slane %v1697_v16, 1  ;;  %v2431_v23 = vld [vmem:[%s2973_s14] sm:$0xff]  }
 0xada   : > { %v1690_v53 = vsel %vm835_vm1, %v1689_v59, 0.0  ;;  %v1721_v25 = vld [vmem:[%s2975_s4] sm:$0x1] }
 0xadb   : > { %v1691_v60 = vrot.slane %v1690_v53, 4  ;;  %v1794_v33 = vld [vmem:[%s2976_s26] sm:$0x1] }
 0xadc   : > { %2290 = vmatpush3.bf16.msra.mxu0 %v2423_v9  ;;  %2298 = vmatpush3.bf16.msra.mxu1 %v2425_v24 }
 0xadd   : > { %v1692_v61 = vadd.f32 %v1691_v60, %v1690_v53  ;;  %2299 = vmatprep.subr.bf16.mxu1 %v2485_v55 }
 0xadf   : > { %v1693_v62 = vrot.slane %v1692_v61, 2 }
 0xae0   : > { %2300 = vmatpush3.bf16.msra.mxu1 %v2426_v10 }
 0xae1   : > { %v1694_v63 = vadd.f32 %v1693_v62, %v1692_v61  ;;  %2301 = vmatprep.subr.bf16.mxu1 %v2485_v55 }
 0xae3   : > { %v1695_v0 = vrot.slane %v1694_v63, 1 }
 0xae4   : > { %2302 = vmatpush3.bf16.msra.mxu1 %v2427_v58 }
 0xae5   : > { %v1696_v1 = vadd.f32 %v1695_v0, %v1694_v63  ;;  %2303 = vmatprep.subr.bf16.mxu1 %v2485_v55 }
 0xae7   : > { %v1698_v2 = vsel %vm835_vm1, %v1696_v1, 0.0 }
 0xae8   : > { %1699 = vadd.xlane.f32.xlu0 %v1698_v2  ;;  %2304 = vmatpush3.bf16.msra.mxu1 %v2428_v56 }
 0xae9   : > { %2305 = vmatprep.subr.bf16.mxu1 %v2485_v55 }
 0xaec   : > { %2306 = vmatpush3.bf16.msra.mxu1 %v2429_v11 }
 0xaed   : > { %2307 = vmatprep.subr.bf16.mxu1 %v2485_v55 }
 0xaf0   : > { %2308 = vmatpush3.bf16.msra.mxu1 %v2430_v12 }
 0xaf1   : > { %2309 = vmatprep.subr.bf16.mxu1 %v2485_v55 }
 0xaf4   : > { %2310 = vmatpush3.bf16.msra.mxu1 %v2431_v23 }
 0xb71   : > { %v1700_v3 = vpop.xlane.xlu0 %1699 }
 0xb72   : > { %v1701_v4 = vmul.f32 0.03125, %v1700_v3 }
 0xb74   : > { %v1702_v5 = vsub.f32 %v1696_v1, %v1701_v4 }
 0xb76   : > { %v1703_v6 = vmul.f32 %v1702_v5, %v1702_v5 }
 0xb78   : > { %v1704_v7 = vsel %vm835_vm1, %v1703_v6, 0.0 }
 0xb79   : > { %1705 = vadd.xlane.f32.xlu0 %v1704_v7 }
 0xc02   : > { %v1706_v13 = vpop.xlane.xlu0 %1705 }
 0xc03   : > { %v1707_v14 = vmul.f32 0.03125, %v1706_v13 }
 0xc05   : > { %v1708_v15 = vadd.f32 1e-12, %v1707_v14 }
 0xc07   : > { %2432 = vrsqrt.f32 %v1708_v15 }
 0xc14   : > { %v2433_v17 = vpop.eup %2432 }
 0xc15   : > { %v1710_v18 = vmul.f32 %v2433_v17, %v1702_v5 }
 0xc17   : > { %v1711_v20 = vmul.f32 %v1710_v18, %v1697_v16 }
 0xc19   : > { %v1715_v21 = vadd.f32 %v1713_v19, %v1711_v20 }
 0xc1b   : > { %v1716_v22 = vpack.c.bf16 %v1715_v21, %v1715_v21 }
 0xc1d   : > { %2292 = vmatmul.mubr.msk.bf16.vlgmr.msra.gmra.mxu0 %vm835_vm1, %v1716_v22 }
 0xcdd   : > { %v1771_v26 = vpop.f32.mrf.mxu0 }
 0xcde   : > { %v1772_v27 = vadd.f32 %v1771_v26, %v1721_v25 }
 0xcdf   : > { %v2293_v28 = vpop.f32.mrf.mxu0 }
 0xce0   : > { %v1777_v29 = vpack.c.bf16 %v1772_v27, %v1772_v27 }
 0xce1   : > { %v1774_v30 = vpop.f32.mrf.mxu0 }
 0xce2   : > { %2312 = vmatmul.mubr.bf16.vlgmr.msra.gmra.mxu1 %v1777_v29 }
 0xce3   : > { %v2294_v31 = vpop.f32.mrf.mxu0 }
 0xda2   : > { %v1877_v34 = vpop.f32.mrf.mxu1 }
 0xda3   : > { %v1878_v35 = vadd.f32 %v1877_v34, %v1794_v33 }
 0xda4   : > { %v2313_v36 = vpop.f32.mrf.mxu1 }
 0xda5   : > { %v1886_v37 = vrot.slane %v1878_v35, %v852_v39 }
 0xda6   : > { %v1880_v41 = vpop.f32.mrf.mxu1 }
 0xda7   : > { %1887 = vst [vmem:[%s2653_s16] sm:$0xff] %v1886_v37 }
 0xda8   : > { %v2314_v42 = vpop.f32.mrf.mxu1 }
 0xda9 PF: > { %s2977_s10 = sld [smem:[#allocation5_spill]] }
 0xdaa   : > { %s2978_s18 = sld [smem:[#allocation3_spill]] }
 0xdab   : > { %s2979_s19 = sld [smem:[#allocation4_spill]] }
 0xdac   : > { %s2980_s20 = sld [smem:[#allocation6_spill]] }
 0xdad   : > { %s2981_s21 = sld [smem:[#allocation7_spill]] }
 0xdaf   : > { %s25_s22 = sadd.s32 1, %s2977_s10  }
 0xdb0   : > { %p22_p9 = scmp.ge.s32.totalorder %s25_s22, 6  }
 0xdb2   :  { %24 = sbr.rel (!%p22_p9) target bundleno = 8 (0x8), region = 142 }

</bundles_post_ra>
